<compile_context>
chip_gen: v6e
topology: v6e:2x2x1
jax: 0.10.0
libtpu: 0.0.40
codegen_flags: <defaults>
</compile_context>

<pallas_src>
import numpy as np
import jax
import jax.numpy as jnp
from jax import lax
from jax.experimental import pallas as pl
from jax.experimental.pallas import tpu as pltpu

EPS = 1e-5          # nn.BatchNorm2d default eps
LEAKY_SLOPE = 0.01  # nn.LeakyReLU default negative_slope


# --------------------- init-time operator construction ----------------------
# (numpy, runs ONCE in __init__; the forward pass itself is one Pallas kernel)

def _deconv_toeplitz(w_ct, h_in, w_in, *, stride=2, pad=1, out_pad=1):
    """Dense matrix of ConvTranspose2d acting on an NHWC-flattened (h*w*c) vector.
    w_ct: (Cin, Cout, kh, kw) PyTorch ConvTranspose2d weight (numpy)."""
    cin, cout, kh, kw = w_ct.shape
    h_out = (h_in - 1) * stride - 2 * pad + kh + out_pad
    w_out = (w_in - 1) * stride - 2 * pad + kw + out_pad
    m = np.zeros((h_in * w_in * cin, h_out * w_out * cout), np.float32)
    for ih in range(h_in):
        for iw in range(w_in):
            for ki in range(kh):
                for kj in range(kw):
                    oh = ih * stride - pad + ki
                    ow = iw * stride - pad + kj
                    if 0 <= oh < h_out and 0 <= ow < w_out:
                        r = (ih * w_in + iw) * cin
                        c = (oh * w_out + ow) * cout
                        m[r:r + cin, c:c + cout] += w_ct[:, :, ki, kj]
    return m, h_out, w_out


def _conv_toeplitz_nchw(w, h_in, w_in, *, pad=1):
    """Dense matrix of stride-1 Conv2d on an NHWC-flattened input whose OUTPUT
    columns are NCHW-ordered (c = co*H*W + oh*W + ow) so the kernel emits NCHW
    directly.  w: (Cout, Cin, kh, kw) PyTorch Conv2d weight (numpy)."""
    cout, cin, kh, kw = w.shape
    h_out = h_in + 2 * pad - kh + 1
    w_out = w_in + 2 * pad - kw + 1
    m = np.zeros((h_in * w_in * cin, cout * h_out * w_out), np.float32)
    for oh in range(h_out):
        for ow in range(w_out):
            for ki in range(kh):
                for kj in range(kw):
                    ih = oh - pad + ki
                    iw = ow - pad + kj
                    if 0 <= ih < h_in and 0 <= iw < w_in:
                        r = (ih * w_in + iw) * cin
                        for co in range(cout):
                            c = co * h_out * w_out + oh * w_out + ow
                            m[r:r + cin, c] += w[co, :, ki, kj]
    return m, h_out, w_out


def _pool_reduce(h, w, c, n_max, c_max):
    """(n_max, c_max) channel-reduce matrix: right-multiplying a (*, h*w*c)
    NHWC-flat slab sums each channel over its h*w spatial positions, pre-scaled
    by 1/(h*w).  Entries are 0 or 1/(h*w) (a power of two) -> exact in bf16."""
    m = np.zeros((n_max, c_max), np.float32)
    s = 1.0 / float(h * w)
    for p in range(h * w):
        for ch in range(c):
            m[p * c + ch, ch] = s
    return m


def _chan_bcast(h, w, c, c_max, n_max):
    """(c_max, n_max) 0/1 matrix broadcasting per-channel values back to every
    spatial position of the NHWC-flat slab.  Exact in bf16."""
    m = np.zeros((c_max, n_max), np.float32)
    for p in range(h * w):
        for ch in range(c):
            m[ch, p * c + ch] = 1.0
    return m


# ------------------------------- Pallas kernel ------------------------------

def _make_forward_kernel(block_dims, out_dims, c_max):
    """Fused forward: (fc folded into block1) -> n x [deconv GEMM + BN + LeakyReLU]
    -> Conv2d GEMM (NCHW columns) + Tanh.  block_dims: list of (K, N, C)."""
    n_blocks = len(block_dims)
    k_out, n_out = out_dims

    def kernel(z_ref, m_ref, pool_ref, bcast_ref, gb_ref, bias_ref, o_ref, st_ref):
        inv_b = 1.0 / z_ref.shape[0]
        h = z_ref[...]                                     # (B, latent_dim) f32

        for i, (k, n, c) in enumerate(block_dims):
            # ConvTranspose2d (block 1: with fc folded in) as a single bf16 GEMM,
            # f32 accumulation.  Deconv biases are omitted: they cancel in BN.
            m = m_ref[i][:k, :n]                           # bf16 (K, N)
            y = jnp.dot(h.astype(jnp.bfloat16), m,
                        preferred_element_type=jnp.float32)
            if i == 0:
                # fc bias pushed through block-1's deconv; it varies per spatial
                # position within a channel, so it does NOT cancel in BN.
                y = y + bias_ref[0:1, :n]

            # BatchNorm2d, training-mode batch stats over (B, H, W):
            # one fused stats GEMM on [sum_b(y); sum_b(y*y)] with the (N, Cmax)
            # channel-reduce pool (bf16 single-pass MXU path).
            st_ref[0:1, :n] = jnp.sum(y, axis=0, keepdims=True)
            st_ref[1:2, :n] = jnp.sum(y * y, axis=0, keepdims=True)
            pooled = jnp.dot(st_ref[:, :n].astype(jnp.bfloat16),
                             pool_ref[i][:n, :],
                             preferred_element_type=jnp.float32) * inv_b
            mean = pooled[0:1, :]                          # (1, Cmax) f32
            var = pooled[1:2, :] - mean * mean             # biased var, f32
            gb = gb_ref[i]                                 # (2, Cmax) f32
            scale = gb[0:1, :] * lax.rsqrt(var + EPS)
            shift = gb[1:2, :] - mean * scale
            # broadcast per-channel (scale, shift) back to the flat slab: one GEMM.
            st_ref[0:1, :c_max] = scale
            st_ref[1:2, :c_max] = shift
            ss = jnp.dot(st_ref[:, :c_max].astype(jnp.bfloat16),
                         bcast_ref[i][:, :n],
                         preferred_element_type=jnp.float32)   # (2, N)
            zn = y * ss[0:1, :] + ss[1:2, :]
            # LeakyReLU (f32 elementwise throughout — v5e VPU has no bf16)
            h = jnp.where(zn >= 0, zn, LEAKY_SLOPE * zn)

        # out_layer: Conv2d as a dense GEMM with NCHW-ordered columns + bias + Tanh
        y = (jnp.dot(h.astype(jnp.bfloat16), m_ref[n_blocks][:k_out, :n_out],
                     preferred_element_type=jnp.float32)
             + bias_ref[1:2, :n_out])
        o_ref[...] = jnp.tanh(y)

    return kernel


def _full_spec(shape):
    nd = len(shape)
    return pl.BlockSpec(shape, lambda i, nd=nd: (0,) * nd)


def _build_forward(block_dims, out_dims, c_max, n_max, out_c, out_h, out_w):
    kernel = _make_forward_kernel(block_dims, out_dims, c_max)
    n_out = out_dims[1]

    @jax.jit
    def forward(z, m_slab, pool_slab, bcast_slab, gb_slab, bias_slab):
        b = z.shape[0]
        args = (z, m_slab, pool_slab, bcast_slab, gb_slab, bias_slab)
        flat = pl.pallas_call(
            kernel,
            grid=(1,),
            in_specs=[_full_spec(a.shape) for a in args],
            out_specs=_full_spec((b, n_out)),
            out_shape=jax.ShapeDtypeStruct((b, n_out), jnp.float32),
            scratch_shapes=[pltpu.VMEM((2, n_max), jnp.float32)],
            compiler_params=pltpu.CompilerParams(
                dimension_semantics=("arbitrary",)),
        )(*args)
        # NCHW comes straight out of the kernel (reordered Toeplitz columns):
        # only a free reshape remains at the model boundary.
        return flat.reshape(b, out_c, out_h, out_w)

    return forward


# ------------------------------- the module --------------------------------

class ConvGeneratorPallas:
    def __init__(self, *, latent_dim, latent_emb_dim, dec_hidden_dims, in_shape, key):
        self.latent_dim = latent_dim
        self.latent_emb_dim = latent_emb_dim
        self.in_channels, self.in_h, self.in_w = in_shape
        self.nfs = [latent_emb_dim, *dec_hidden_dims, self.in_channels]
        self.n_deconv = len(self.nfs) - 1
        last_h = 2 ** self.n_deconv
        last_w = 2 ** self.n_deconv
        # compute_ks_for_conv2d with stride=1, padding=1:  k = w_in - w_out + 3
        self.last_k_h = last_h - self.in_h + 3
        self.last_k_w = last_w - self.in_w + 3

        # Deterministic synthetic parameter init (same layout as previous version).
        keys = jax.random.split(key, 2 + 2 * self.n_deconv + 2)
        ki = iter(range(len(keys)))
        s = 0.1
        self.fc_w = s * jax.random.normal(keys[next(ki)], (latent_emb_dim, latent_dim), jnp.float32)
        self.fc_b = s * jax.random.normal(keys[next(ki)], (latent_emb_dim,), jnp.float32)
        # TODO(synk): `deconv_blocks` source not provided; assumed each block is
        # ConvTranspose2d(k=3, stride=2, padding=1, output_padding=1) + BatchNorm2d +
        # act_fn (spatial doubling, consistent with `last_h = 2 ** n_deconv_blocks`).
        self.dec_w, self.dec_b, self.bn_g, self.bn_b = [], [], [], []
        for cin, cout in zip(self.nfs[:-1], self.nfs[1:]):
            self.dec_w.append(s * jax.random.normal(keys[next(ki)], (cin, cout, 3, 3), jnp.float32))
            self.dec_b.append(s * jax.random.normal(keys[next(ki)], (cout,), jnp.float32))
            self.bn_g.append(jnp.ones((cout,), jnp.float32))
            self.bn_b.append(jnp.zeros((cout,), jnp.float32))
        c = self.in_channels
        self.out_w = s * jax.random.normal(
            keys[next(ki)], (c, c, self.last_k_h, self.last_k_w), jnp.float32)
        self.out_b = s * jax.random.normal(keys[next(ki)], (c,), jnp.float32)

        # ---- hoisted weight preprocessing (runs once, never in __call__) ----
        dims = []     # per block: (K, N, C, H, W)
        ms = []       # dense f32 layer matrices before padding / bf16 cast
        bias1 = None
        h_cur, w_cur = 1, 1
        for i, (cin, cout) in enumerate(zip(self.nfs[:-1], self.nfs[1:])):
            m, h_cur, w_cur = _deconv_toeplitz(np.asarray(self.dec_w[i], np.float32),
                                               h_cur, w_cur)
            if i == 0:
                # Fold fc_latent2flatten into block 1:  z @ (fc_w^T @ M1) + fc_b @ M1
                fc_w = np.asarray(self.fc_w, np.float32)
                fc_b = np.asarray(self.fc_b, np.float32)
                bias1 = fc_b @ m                  # (N1,) — does NOT cancel in BN
                m = fc_w.T @ m                    # (latent_dim, N1)
            # NOTE: deconv bias dec_b[i] is intentionally NOT materialized: a
            # per-channel constant before training-mode BatchNorm cancels exactly.
            ms.append(m)
            dims.append((m.shape[0], m.shape[1], cout, h_cur, w_cur))

        m_out, h_o, w_o = _conv_toeplitz_nchw(np.asarray(self.out_w, np.float32),
                                              h_cur, w_cur, pad=1)
        assert (h_o, w_o) == (self.in_h, self.in_w), (h_o, w_o)
        out_k, out_n = m_out.shape
        ms.append(m_out)

        k_max = max(m.shape[0] for m in ms)
        n_max = max(m.shape[1] for m in ms)
        c_max = max(d[2] for d in dims)

        # Pad-and-stack: 6 input DMAs total instead of ~20 tiny descriptors.
        m_slab = np.zeros((len(ms), k_max, n_max), np.float32)
        for i, m in enumerate(ms):
            m_slab[i, :m.shape[0], :m.shape[1]] = m

        pool_slab = np.zeros((self.n_deconv, n_max, c_max), np.float32)
        bcast_slab = np.zeros((self.n_deconv, c_max, n_max), np.float32)
        gb_slab = np.zeros((self.n_deconv, 2, c_max), np.float32)  # pad gamma=0 -> pad chans stay 0
        for i, (_, n, cch, hh, ww) in enumerate(dims):
            pool_slab[i] = _pool_reduce(hh, ww, cch, n_max, c_max)
            bcast_slab[i] = _chan_bcast(hh, ww, cch, c_max, n_max)
            gb_slab[i, 0, :cch] = np.asarray(self.bn_g[i], np.float32)
            gb_slab[i, 1, :cch] = np.asarray(self.bn_b[i], np.float32)

        bias_slab = np.zeros((2, n_max), np.float32)
        bias_slab[0, :dims[0][1]] = bias1
        bias_slab[1, :out_n] = np.repeat(np.asarray(self.out_b, np.float32),
                                         self.in_h * self.in_w)   # NCHW-ordered

        self._operands = (
            jnp.asarray(m_slab, jnp.bfloat16),
            jnp.asarray(pool_slab, jnp.bfloat16),   # 0 / 1/(H*W): exact in bf16
            jnp.asarray(bcast_slab, jnp.bfloat16),  # 0/1: exact in bf16
            jnp.asarray(gb_slab, jnp.float32),
            jnp.asarray(bias_slab, jnp.float32),
        )
        block_dims = [(k, n, cch) for (k, n, cch, _, _) in dims]
        self._forward = _build_forward(block_dims, (out_k, out_n), c_max, n_max,
                                       self.in_channels, self.in_h, self.in_w)

    def __call__(self, z):
        return self._forward(z, *self._operands)


# --------------------- pure-JAX reference (validation only) -----------------

def _reference_forward(model, z):
    """Independent f32 NHWC reference (dilate+pad lowering of ConvTranspose2d).
    Includes fc and deconv biases explicitly, so it also validates the
    bias-cancellation and fc-folding done in the kernel."""
    b = z.shape[0]
    x = (z @ model.fc_w.T + model.fc_b).reshape(b, 1, 1, model.latent_emb_dim)
    for i in range(model.n_deconv):
        w_ct, bias = model.dec_w[i], model.dec_b[i]
        gamma, beta = model.bn_g[i], model.bn_b[i]
        bb, hh, ww, cin = x.shape
        _, cout, kh, kw = w_ct.shape
        stride, pad, out_pad = 2, 1, 1
        hd, wd = (hh - 1) * stride + 1, (ww - 1) * stride + 1
        xd = jnp.zeros((bb, hd, wd, cin), x.dtype).at[:, ::stride, ::stride, :].set(x)
        lo, hi = kh - 1 - pad, kh - 1 - pad + out_pad
        xp = jnp.pad(xd, ((0, 0), (lo, hi), (lo, hi), (0, 0)))
        ho, wo = hd + lo + hi - kh + 1, wd + lo + hi - kw + 1
        w_flip = jnp.flip(w_ct, axis=(2, 3))
        y = jnp.zeros((bb, ho, wo, cout), jnp.float32)
        for ii in range(kh):
            for jj in range(kw):
                y = y + jnp.einsum('bhwc,cd->bhwd',
                                   xp[:, ii:ii + ho, jj:jj + wo, :], w_flip[:, :, ii, jj])
        y = y + bias
        mean = jnp.mean(y, axis=(0, 1, 2))
        var = jnp.var(y, axis=(0, 1, 2))
        y = (y - mean) * lax.rsqrt(var + EPS) * gamma + beta
        x = jnp.where(y >= 0, y, LEAKY_SLOPE * y)
    w, bias = model.out_w, model.out_b
    cout, cin, kh, kw = w.shape
    pad = 1
    bb, hh, ww, _ = x.shape
    xp = jnp.pad(x, ((0, 0), (pad, pad), (pad, pad), (0, 0)))
    ho, wo = hh + 2 * pad - kh + 1, ww + 2 * pad - kw + 1
    y = jnp.zeros((bb, ho, wo, cout), jnp.float32)
    for ii in range(kh):
        for jj in range(kw):
            y = y + jnp.einsum('bhwc,dc->bhwd',
                               xp[:, ii:ii + ho, jj:jj + wo, :], w[:, :, ii, jj])
    return jnp.tanh(y + bias).transpose(0, 3, 1, 2)


# --------------------------------- main -------------------------------------

if __name__ == "__main__":
    key = jax.random.PRNGKey(0)
    k_params, k_z = jax.random.split(key)

    latent_dim = 8
    latent_emb_dim = 16
    dec_hidden_dims = [32, 16]
    in_shape = (3, 8, 8)   # nfs=[16,32,16,3] -> 3 deconv blocks -> last_h = last_w = 8

    model = ConvGeneratorPallas(
        latent_dim=latent_dim,
        latent_emb_dim=latent_emb_dim,
        dec_hidden_dims=dec_hidden_dims,
        in_shape=in_shape,
        key=k_params,
    )

    z = jax.random.normal(k_z, (2, latent_dim), jnp.float32)
    x_gen = jax.block_until_ready(model(z))
    assert x_gen.shape == (2, 3, 8, 8), x_gen.shape
    assert bool(jnp.all(jnp.isfinite(x_gen)))

    x_ref = jax.block_until_ready(_reference_forward(model, z))
    err = float(jnp.max(jnp.abs(x_gen - x_ref)))
    assert err < 5e-2, f"mismatch vs pure-JAX reference: max abs err = {err}"

    print("KERNEL_OK")
</pallas_src>

<mosaic_0001>
module attributes {stable_mosaic.version = 11 : i64} {
  func.func @kernel(%arg0: i32, %arg1: memref<2x8xf32, #tpu.memory_space<vmem>>, %arg2: memref<4x256x256xbf16, #tpu.memory_space<vmem>>, %arg3: memref<3x256x32xbf16, #tpu.memory_space<vmem>>, %arg4: memref<3x32x256xbf16, #tpu.memory_space<vmem>>, %arg5: memref<3x2x32xf32, #tpu.memory_space<vmem>>, %arg6: memref<2x256xf32, #tpu.memory_space<vmem>>, %arg7: memref<2x192xf32, #tpu.memory_space<vmem>>, %arg8: memref<2x256xf32, #tpu.memory_space<vmem>>) attributes {dimension_semantics = [#tpu.dimension_semantics<arbitrary>], iteration_bounds = array<i64: 1>, scalar_prefetch = 0 : i64, scratch_operands = 1 : i64, tpu.core_type = #tpu.core_type<tc>, window_params = [{pipeline_mode = #tpu.pipeline_mode<synchronous>, transform_indices = @transform_0, window_bounds = array<i64: 2, 8>}, {pipeline_mode = #tpu.pipeline_mode<synchronous>, transform_indices = @transform_1, window_bounds = array<i64: 4, 256, 256>}, {pipeline_mode = #tpu.pipeline_mode<synchronous>, transform_indices = @transform_2, window_bounds = array<i64: 3, 256, 32>}, {pipeline_mode = #tpu.pipeline_mode<synchronous>, transform_indices = @transform_3, window_bounds = array<i64: 3, 32, 256>}, {pipeline_mode = #tpu.pipeline_mode<synchronous>, transform_indices = @transform_4, window_bounds = array<i64: 3, 2, 32>}, {pipeline_mode = #tpu.pipeline_mode<synchronous>, transform_indices = @transform_5, window_bounds = array<i64: 2, 256>}, {pipeline_mode = #tpu.pipeline_mode<synchronous>, transform_indices = @transform_6, window_bounds = array<i64: 2, 192>}]} {
    %c0 = arith.constant 0 : index
    %c0_0 = arith.constant 0 : index
    %0 = vector.load %arg1[%c0, %c0_0] : memref<2x8xf32, #tpu.memory_space<vmem>>, vector<2x8xf32>
    %c0_1 = arith.constant 0 : index
    %c0_2 = arith.constant 0 : index
    %c0_3 = arith.constant 0 : index
    %1 = vector.load %arg2[%c0_1, %c0_2, %c0_3] : memref<4x256x256xbf16, #tpu.memory_space<vmem>>, vector<1x256x256xbf16>
    %2 = vector.shape_cast %1 : vector<1x256x256xbf16> to vector<256x256xbf16>
    %3 = vector.extract_strided_slice %2 {offsets = [0, 0], sizes = [8, 128], strides = [1, 1]} : vector<256x256xbf16> to vector<8x128xbf16>
    %4 = arith.truncf %0 : vector<2x8xf32> to vector<2x8xbf16>
    %cst = arith.constant dense<0.000000e+00> : vector<2x128xf32>
    %5 = tpu.matmul %4, %3, %cst {dimension_numbers = #tpu.dot_dimension_numbers<[1], [0], [0], [1], [0, 0, 1, 1], [], []>} : vector<2x8xbf16>, vector<8x128xbf16>, vector<2x128xf32> -> vector<2x128xf32>
    %c0_4 = arith.constant 0 : index
    %c0_5 = arith.constant 0 : index
    %6 = vector.load %arg6[%c0_4, %c0_5] : memref<2x256xf32, #tpu.memory_space<vmem>>, vector<1x128xf32>
    %7 = vector.broadcast %6 : vector<1x128xf32> to vector<2x128xf32>
    %8 = arith.addf %5, %7 : vector<2x128xf32>
    %cst_6 = arith.constant dense<0.000000e+00> : vector<128xf32>
    %9 = vector.multi_reduction <add>, %8, %cst_6 [0] : vector<2x128xf32> to vector<128xf32>
    %10 = vector.shape_cast %9 : vector<128xf32> to vector<1x128xf32>
    %c0_7 = arith.constant 0 : index
    %c0_8 = arith.constant 0 : index
    %11 = vector.load %arg8[%c0_7, %c0_8] : memref<2x256xf32, #tpu.memory_space<vmem>>, vector<1x128xf32>
    tpu.vector_store %arg8[%c0_7, %c0_8], %10 {strides = array<i32>} : memref<2x256xf32, #tpu.memory_space<vmem>>, vector<1x128xf32>,
    %12 = arith.mulf %8, %8 : vector<2x128xf32>
    %cst_9 = arith.constant dense<0.000000e+00> : vector<128xf32>
    %13 = vector.multi_reduction <add>, %12, %cst_9 [0] : vector<2x128xf32> to vector<128xf32>
    %14 = vector.shape_cast %13 : vector<128xf32> to vector<1x128xf32>
    %c1 = arith.constant 1 : index
    %c0_10 = arith.constant 0 : index
    %15 = vector.load %arg8[%c1, %c0_10] : memref<2x256xf32, #tpu.memory_space<vmem>>, vector<1x128xf32>
    tpu.vector_store %arg8[%c1, %c0_10], %14 {strides = array<i32>} : memref<2x256xf32, #tpu.memory_space<vmem>>, vector<1x128xf32>,
    %c0_11 = arith.constant 0 : index
    %c0_12 = arith.constant 0 : index
    %16 = vector.load %arg8[%c0_11, %c0_12] : memref<2x256xf32, #tpu.memory_space<vmem>>, vector<2x128xf32>
    %17 = arith.truncf %16 : vector<2x128xf32> to vector<2x128xbf16>
    %c0_13 = arith.constant 0 : index
    %c0_14 = arith.constant 0 : index
    %c0_15 = arith.constant 0 : index
    %18 = vector.load %arg3[%c0_13, %c0_14, %c0_15] : memref<3x256x32xbf16, #tpu.memory_space<vmem>>, vector<1x256x32xbf16>
    %19 = vector.shape_cast %18 : vector<1x256x32xbf16> to vector<256x32xbf16>
    %20 = vector.extract_strided_slice %19 {offsets = [0, 0], sizes = [128, 32], strides = [1, 1]} : vector<256x32xbf16> to vector<128x32xbf16>
    %cst_16 = arith.constant dense<0.000000e+00> : vector<2x32xf32>
    %21 = tpu.matmul %17, %20, %cst_16 {dimension_numbers = #tpu.dot_dimension_numbers<[1], [0], [0], [1], [0, 0, 1, 1], [], []>} : vector<2x128xbf16>, vector<128x32xbf16>, vector<2x32xf32> -> vector<2x32xf32>
    %cst_17 = arith.constant 5.000000e-01 : f32
    %22 = vector.broadcast %cst_17 : f32 to vector<2x32xf32>
    %23 = arith.mulf %21, %22 : vector<2x32xf32>
    %24 = vector.extract_strided_slice %23 {offsets = [0, 0], sizes = [1, 32], strides = [1, 1]} : vector<2x32xf32> to vector<1x32xf32>
    %25 = vector.extract_strided_slice %23 {offsets = [1, 0], sizes = [1, 32], strides = [1, 1]} : vector<2x32xf32> to vector<1x32xf32>
    %26 = arith.mulf %24, %24 : vector<1x32xf32>
    %27 = arith.subf %25, %26 : vector<1x32xf32>
    %c0_18 = arith.constant 0 : index
    %c0_19 = arith.constant 0 : index
    %c0_20 = arith.constant 0 : index
    %28 = vector.load %arg5[%c0_18, %c0_19, %c0_20] : memref<3x2x32xf32, #tpu.memory_space<vmem>>, vector<1x2x32xf32>
    %29 = vector.shape_cast %28 : vector<1x2x32xf32> to vector<2x32xf32>
    %30 = vector.extract_strided_slice %29 {offsets = [0, 0], sizes = [1, 32], strides = [1, 1]} : vector<2x32xf32> to vector<1x32xf32>
    %cst_21 = arith.constant 9.99999974E-6 : f32
    %31 = vector.broadcast %cst_21 : f32 to vector<1x32xf32>
    %32 = arith.addf %27, %31 : vector<1x32xf32>
    %33 = math.rsqrt %32 : vector<1x32xf32>
    %34 = arith.mulf %30, %33 : vector<1x32xf32>
    %35 = vector.extract_strided_slice %29 {offsets = [1, 0], sizes = [1, 32], strides = [1, 1]} : vector<2x32xf32> to vector<1x32xf32>
    %36 = arith.mulf %24, %34 : vector<1x32xf32>
    %37 = arith.subf %35, %36 : vector<1x32xf32>
    %c0_22 = arith.constant 0 : index
    %c0_23 = arith.constant 0 : index
    %38 = vector.load %arg8[%c0_22, %c0_23] : memref<2x256xf32, #tpu.memory_space<vmem>>, vector<1x32xf32>
    tpu.vector_store %arg8[%c0_22, %c0_23], %34 {strides = array<i32>} : memref<2x256xf32, #tpu.memory_space<vmem>>, vector<1x32xf32>,
    %c1_24 = arith.constant 1 : index
    %c0_25 = arith.constant 0 : index
    %39 = vector.load %arg8[%c1_24, %c0_25] : memref<2x256xf32, #tpu.memory_space<vmem>>, vector<1x32xf32>
    tpu.vector_store %arg8[%c1_24, %c0_25], %37 {strides = array<i32>} : memref<2x256xf32, #tpu.memory_space<vmem>>, vector<1x32xf32>,
    %c0_26 = arith.constant 0 : index
    %c0_27 = arith.constant 0 : index
    %40 = vector.load %arg8[%c0_26, %c0_27] : memref<2x256xf32, #tpu.memory_space<vmem>>, vector<2x32xf32>
    %41 = arith.truncf %40 : vector<2x32xf32> to vector<2x32xbf16>
    %c0_28 = arith.constant 0 : index
    %c0_29 = arith.constant 0 : index
    %c0_30 = arith.constant 0 : index
    %42 = vector.load %arg4[%c0_28, %c0_29, %c0_30] : memref<3x32x256xbf16, #tpu.memory_space<vmem>>, vector<1x32x256xbf16>
    %43 = vector.shape_cast %42 : vector<1x32x256xbf16> to vector<32x256xbf16>
    %44 = vector.extract_strided_slice %43 {offsets = [0, 0], sizes = [32, 128], strides = [1, 1]} : vector<32x256xbf16> to vector<32x128xbf16>
    %cst_31 = arith.constant dense<0.000000e+00> : vector<2x128xf32>
    %45 = tpu.matmul %41, %44, %cst_31 {dimension_numbers = #tpu.dot_dimension_numbers<[1], [0], [0], [1], [0, 0, 1, 1], [], []>} : vector<2x32xbf16>, vector<32x128xbf16>, vector<2x128xf32> -> vector<2x128xf32>
    %46 = vector.extract_strided_slice %45 {offsets = [0, 0], sizes = [1, 128], strides = [1, 1]} : vector<2x128xf32> to vector<1x128xf32>
    %47 = vector.broadcast %46 : vector<1x128xf32> to vector<2x128xf32>
    %48 = arith.mulf %8, %47 : vector<2x128xf32>
    %49 = vector.extract_strided_slice %45 {offsets = [1, 0], sizes = [1, 128], strides = [1, 1]} : vector<2x128xf32> to vector<1x128xf32>
    %50 = vector.broadcast %49 : vector<1x128xf32> to vector<2x128xf32>
    %51 = arith.addf %48, %50 : vector<2x128xf32>
    %cst_32 = arith.constant 0.000000e+00 : f32
    %52 = vector.broadcast %cst_32 : f32 to vector<2x128xf32>
    %53 = arith.cmpf oge, %51, %52 : vector<2x128xf32>
    %cst_33 = arith.constant 0.00999999977 : f32
    %54 = vector.broadcast %cst_33 : f32 to vector<2x128xf32>
    %55 = arith.mulf %54, %51 : vector<2x128xf32>
    %56 = arith.select %53, %51, %55 : vector<2x128xi1>, vector<2x128xf32>
    %c1_34 = arith.constant 1 : index
    %c0_35 = arith.constant 0 : index
    %c0_36 = arith.constant 0 : index
    %57 = vector.load %arg2[%c1_34, %c0_35, %c0_36] : memref<4x256x256xbf16, #tpu.memory_space<vmem>>, vector<1x256x256xbf16>
    %58 = vector.shape_cast %57 : vector<1x256x256xbf16> to vector<256x256xbf16>
    %59 = vector.extract_strided_slice %58 {offsets = [0, 0], sizes = [128, 256], strides = [1, 1]} : vector<256x256xbf16> to vector<128x256xbf16>
    %60 = arith.truncf %56 : vector<2x128xf32> to vector<2x128xbf16>
    %cst_37 = arith.constant dense<0.000000e+00> : vector<2x256xf32>
    %61 = tpu.matmul %60, %59, %cst_37 {dimension_numbers = #tpu.dot_dimension_numbers<[1], [0], [0], [1], [0, 0, 1, 1], [], []>} : vector<2x128xbf16>, vector<128x256xbf16>, vector<2x256xf32> -> vector<2x256xf32>
    %cst_38 = arith.constant dense<0.000000e+00> : vector<256xf32>
    %62 = vector.multi_reduction <add>, %61, %cst_38 [0] : vector<2x256xf32> to vector<256xf32>
    %63 = vector.shape_cast %62 : vector<256xf32> to vector<1x256xf32>
    %c0_39 = arith.constant 0 : index
    %c0_40 = arith.constant 0 : index
    %64 = vector.load %arg8[%c0_39, %c0_40] : memref<2x256xf32, #tpu.memory_space<vmem>>, vector<1x256xf32>
    tpu.vector_store %arg8[%c0_39, %c0_40], %63 {strides = array<i32>} : memref<2x256xf32, #tpu.memory_space<vmem>>, vector<1x256xf32>,
    %65 = arith.mulf %61, %61 : vector<2x256xf32>
    %cst_41 = arith.constant dense<0.000000e+00> : vector<256xf32>
    %66 = vector.multi_reduction <add>, %65, %cst_41 [0] : vector<2x256xf32> to vector<256xf32>
    %67 = vector.shape_cast %66 : vector<256xf32> to vector<1x256xf32>
    %c1_42 = arith.constant 1 : index
    %c0_43 = arith.constant 0 : index
    %68 = vector.load %arg8[%c1_42, %c0_43] : memref<2x256xf32, #tpu.memory_space<vmem>>, vector<1x256xf32>
    tpu.vector_store %arg8[%c1_42, %c0_43], %67 {strides = array<i32>} : memref<2x256xf32, #tpu.memory_space<vmem>>, vector<1x256xf32>,
    %c0_44 = arith.constant 0 : index
    %c0_45 = arith.constant 0 : index
    %69 = vector.load %arg8[%c0_44, %c0_45] : memref<2x256xf32, #tpu.memory_space<vmem>>, vector<2x256xf32>
    %70 = arith.truncf %69 : vector<2x256xf32> to vector<2x256xbf16>
    %c1_46 = arith.constant 1 : index
    %c0_47 = arith.constant 0 : index
    %c0_48 = arith.constant 0 : index
    %71 = vector.load %arg3[%c1_46, %c0_47, %c0_48] : memref<3x256x32xbf16, #tpu.memory_space<vmem>>, vector<1x256x32xbf16>
    %72 = vector.shape_cast %71 : vector<1x256x32xbf16> to vector<256x32xbf16>
    %cst_49 = arith.constant dense<0.000000e+00> : vector<2x32xf32>
    %73 = tpu.matmul %70, %72, %cst_49 {dimension_numbers = #tpu.dot_dimension_numbers<[1], [0], [0], [1], [0, 0, 1, 1], [], []>} : vector<2x256xbf16>, vector<256x32xbf16>, vector<2x32xf32> -> vector<2x32xf32>
    %cst_50 = arith.constant 5.000000e-01 : f32
    %74 = vector.broadcast %cst_50 : f32 to vector<2x32xf32>
    %75 = arith.mulf %73, %74 : vector<2x32xf32>
    %76 = vector.extract_strided_slice %75 {offsets = [0, 0], sizes = [1, 32], strides = [1, 1]} : vector<2x32xf32> to vector<1x32xf32>
    %77 = vector.extract_strided_slice %75 {offsets = [1, 0], sizes = [1, 32], strides = [1, 1]} : vector<2x32xf32> to vector<1x32xf32>
    %78 = arith.mulf %76, %76 : vector<1x32xf32>
    %79 = arith.subf %77, %78 : vector<1x32xf32>
    %c1_51 = arith.constant 1 : index
    %c0_52 = arith.constant 0 : index
    %c0_53 = arith.constant 0 : index
    %80 = vector.load %arg5[%c1_51, %c0_52, %c0_53] : memref<3x2x32xf32, #tpu.memory_space<vmem>>, vector<1x2x32xf32>
    %81 = vector.shape_cast %80 : vector<1x2x32xf32> to vector<2x32xf32>
    %82 = vector.extract_strided_slice %81 {offsets = [0, 0], sizes = [1, 32], strides = [1, 1]} : vector<2x32xf32> to vector<1x32xf32>
    %cst_54 = arith.constant 9.99999974E-6 : f32
    %83 = vector.broadcast %cst_54 : f32 to vector<1x32xf32>
    %84 = arith.addf %79, %83 : vector<1x32xf32>
    %85 = math.rsqrt %84 : vector<1x32xf32>
    %86 = arith.mulf %82, %85 : vector<1x32xf32>
    %87 = vector.extract_strided_slice %81 {offsets = [1, 0], sizes = [1, 32], strides = [1, 1]} : vector<2x32xf32> to vector<1x32xf32>
    %88 = arith.mulf %76, %86 : vector<1x32xf32>
    %89 = arith.subf %87, %88 : vector<1x32xf32>
    %c0_55 = arith.constant 0 : index
    %c0_56 = arith.constant 0 : index
    %90 = vector.load %arg8[%c0_55, %c0_56] : memref<2x256xf32, #tpu.memory_space<vmem>>, vector<1x32xf32>
    tpu.vector_store %arg8[%c0_55, %c0_56], %86 {strides = array<i32>} : memref<2x256xf32, #tpu.memory_space<vmem>>, vector<1x32xf32>,
    %c1_57 = arith.constant 1 : index
    %c0_58 = arith.constant 0 : index
    %91 = vector.load %arg8[%c1_57, %c0_58] : memref<2x256xf32, #tpu.memory_space<vmem>>, vector<1x32xf32>
    tpu.vector_store %arg8[%c1_57, %c0_58], %89 {strides = array<i32>} : memref<2x256xf32, #tpu.memory_space<vmem>>, vector<1x32xf32>,
    %c0_59 = arith.constant 0 : index
    %c0_60 = arith.constant 0 : index
    %92 = vector.load %arg8[%c0_59, %c0_60] : memref<2x256xf32, #tpu.memory_space<vmem>>, vector<2x32xf32>
    %93 = arith.truncf %92 : vector<2x32xf32> to vector<2x32xbf16>
    %c1_61 = arith.constant 1 : index
    %c0_62 = arith.constant 0 : index
    %c0_63 = arith.constant 0 : index
    %94 = vector.load %arg4[%c1_61, %c0_62, %c0_63] : memref<3x32x256xbf16, #tpu.memory_space<vmem>>, vector<1x32x256xbf16>
    %95 = vector.shape_cast %94 : vector<1x32x256xbf16> to vector<32x256xbf16>
    %cst_64 = arith.constant dense<0.000000e+00> : vector<2x256xf32>
    %96 = tpu.matmul %93, %95, %cst_64 {dimension_numbers = #tpu.dot_dimension_numbers<[1], [0], [0], [1], [0, 0, 1, 1], [], []>} : vector<2x32xbf16>, vector<32x256xbf16>, vector<2x256xf32> -> vector<2x256xf32>
    %97 = vector.extract_strided_slice %96 {offsets = [0, 0], sizes = [1, 256], strides = [1, 1]} : vector<2x256xf32> to vector<1x256xf32>
    %98 = vector.broadcast %97 : vector<1x256xf32> to vector<2x256xf32>
    %99 = arith.mulf %61, %98 : vector<2x256xf32>
    %100 = vector.extract_strided_slice %96 {offsets = [1, 0], sizes = [1, 256], strides = [1, 1]} : vector<2x256xf32> to vector<1x256xf32>
    %101 = vector.broadcast %100 : vector<1x256xf32> to vector<2x256xf32>
    %102 = arith.addf %99, %101 : vector<2x256xf32>
    %cst_65 = arith.constant 0.000000e+00 : f32
    %103 = vector.broadcast %cst_65 : f32 to vector<2x256xf32>
    %104 = arith.cmpf oge, %102, %103 : vector<2x256xf32>
    %cst_66 = arith.constant 0.00999999977 : f32
    %105 = vector.broadcast %cst_66 : f32 to vector<2x256xf32>
    %106 = arith.mulf %105, %102 : vector<2x256xf32>
    %107 = arith.select %104, %102, %106 : vector<2x256xi1>, vector<2x256xf32>
    %c2 = arith.constant 2 : index
    %c0_67 = arith.constant 0 : index
    %c0_68 = arith.constant 0 : index
    %108 = vector.load %arg2[%c2, %c0_67, %c0_68] : memref<4x256x256xbf16, #tpu.memory_space<vmem>>, vector<1x256x256xbf16>
    %109 = vector.shape_cast %108 : vector<1x256x256xbf16> to vector<256x256xbf16>
    %110 = vector.extract_strided_slice %109 {offsets = [0, 0], sizes = [256, 192], strides = [1, 1]} : vector<256x256xbf16> to vector<256x192xbf16>
    %111 = arith.truncf %107 : vector<2x256xf32> to vector<2x256xbf16>
    %cst_69 = arith.constant dense<0.000000e+00> : vector<2x192xf32>
    %112 = tpu.matmul %111, %110, %cst_69 {dimension_numbers = #tpu.dot_dimension_numbers<[1], [0], [0], [1], [0, 0, 1, 1], [], []>} : vector<2x256xbf16>, vector<256x192xbf16>, vector<2x192xf32> -> vector<2x192xf32>
    %cst_70 = arith.constant dense<0.000000e+00> : vector<192xf32>
    %113 = vector.multi_reduction <add>, %112, %cst_70 [0] : vector<2x192xf32> to vector<192xf32>
    %114 = vector.shape_cast %113 : vector<192xf32> to vector<1x192xf32>
    %c0_71 = arith.constant 0 : index
    %c0_72 = arith.constant 0 : index
    %115 = vector.load %arg8[%c0_71, %c0_72] : memref<2x256xf32, #tpu.memory_space<vmem>>, vector<1x192xf32>
    tpu.vector_store %arg8[%c0_71, %c0_72], %114 {strides = array<i32>} : memref<2x256xf32, #tpu.memory_space<vmem>>, vector<1x192xf32>,
    %116 = arith.mulf %112, %112 : vector<2x192xf32>
    %cst_73 = arith.constant dense<0.000000e+00> : vector<192xf32>
    %117 = vector.multi_reduction <add>, %116, %cst_73 [0] : vector<2x192xf32> to vector<192xf32>
    %118 = vector.shape_cast %117 : vector<192xf32> to vector<1x192xf32>
    %c1_74 = arith.constant 1 : index
    %c0_75 = arith.constant 0 : index
    %119 = vector.load %arg8[%c1_74, %c0_75] : memref<2x256xf32, #tpu.memory_space<vmem>>, vector<1x192xf32>
    tpu.vector_store %arg8[%c1_74, %c0_75], %118 {strides = array<i32>} : memref<2x256xf32, #tpu.memory_space<vmem>>, vector<1x192xf32>,
    %c0_76 = arith.constant 0 : index
    %c0_77 = arith.constant 0 : index
    %120 = vector.load %arg8[%c0_76, %c0_77] : memref<2x256xf32, #tpu.memory_space<vmem>>, vector<2x192xf32>
    %121 = arith.truncf %120 : vector<2x192xf32> to vector<2x192xbf16>
    %c2_78 = arith.constant 2 : index
    %c0_79 = arith.constant 0 : index
    %c0_80 = arith.constant 0 : index
    %122 = vector.load %arg3[%c2_78, %c0_79, %c0_80] : memref<3x256x32xbf16, #tpu.memory_space<vmem>>, vector<1x256x32xbf16>
    %123 = vector.shape_cast %122 : vector<1x256x32xbf16> to vector<256x32xbf16>
    %124 = vector.extract_strided_slice %123 {offsets = [0, 0], sizes = [192, 32], strides = [1, 1]} : vector<256x32xbf16> to vector<192x32xbf16>
    %cst_81 = arith.constant dense<0.000000e+00> : vector<2x32xf32>
    %125 = tpu.matmul %121, %124, %cst_81 {dimension_numbers = #tpu.dot_dimension_numbers<[1], [0], [0], [1], [0, 0, 1, 1], [], []>} : vector<2x192xbf16>, vector<192x32xbf16>, vector<2x32xf32> -> vector<2x32xf32>
    %cst_82 = arith.constant 5.000000e-01 : f32
    %126 = vector.broadcast %cst_82 : f32 to vector<2x32xf32>
    %127 = arith.mulf %125, %126 : vector<2x32xf32>
    %128 = vector.extract_strided_slice %127 {offsets = [0, 0], sizes = [1, 32], strides = [1, 1]} : vector<2x32xf32> to vector<1x32xf32>
    %129 = vector.extract_strided_slice %127 {offsets = [1, 0], sizes = [1, 32], strides = [1, 1]} : vector<2x32xf32> to vector<1x32xf32>
    %130 = arith.mulf %128, %128 : vector<1x32xf32>
    %131 = arith.subf %129, %130 : vector<1x32xf32>
    %c2_83 = arith.constant 2 : index
    %c0_84 = arith.constant 0 : index
    %c0_85 = arith.constant 0 : index
    %132 = vector.load %arg5[%c2_83, %c0_84, %c0_85] : memref<3x2x32xf32, #tpu.memory_space<vmem>>, vector<1x2x32xf32>
    %133 = vector.shape_cast %132 : vector<1x2x32xf32> to vector<2x32xf32>
    %134 = vector.extract_strided_slice %133 {offsets = [0, 0], sizes = [1, 32], strides = [1, 1]} : vector<2x32xf32> to vector<1x32xf32>
    %cst_86 = arith.constant 9.99999974E-6 : f32
    %135 = vector.broadcast %cst_86 : f32 to vector<1x32xf32>
    %136 = arith.addf %131, %135 : vector<1x32xf32>
    %137 = math.rsqrt %136 : vector<1x32xf32>
    %138 = arith.mulf %134, %137 : vector<1x32xf32>
    %139 = vector.extract_strided_slice %133 {offsets = [1, 0], sizes = [1, 32], strides = [1, 1]} : vector<2x32xf32> to vector<1x32xf32>
    %140 = arith.mulf %128, %138 : vector<1x32xf32>
    %141 = arith.subf %139, %140 : vector<1x32xf32>
    %c0_87 = arith.constant 0 : index
    %c0_88 = arith.constant 0 : index
    %142 = vector.load %arg8[%c0_87, %c0_88] : memref<2x256xf32, #tpu.memory_space<vmem>>, vector<1x32xf32>
    tpu.vector_store %arg8[%c0_87, %c0_88], %138 {strides = array<i32>} : memref<2x256xf32, #tpu.memory_space<vmem>>, vector<1x32xf32>,
    %c1_89 = arith.constant 1 : index
    %c0_90 = arith.constant 0 : index
    %143 = vector.load %arg8[%c1_89, %c0_90] : memref<2x256xf32, #tpu.memory_space<vmem>>, vector<1x32xf32>
    tpu.vector_store %arg8[%c1_89, %c0_90], %141 {strides = array<i32>} : memref<2x256xf32, #tpu.memory_space<vmem>>, vector<1x32xf32>,
    %c0_91 = arith.constant 0 : index
    %c0_92 = arith.constant 0 : index
    %144 = vector.load %arg8[%c0_91, %c0_92] : memref<2x256xf32, #tpu.memory_space<vmem>>, vector<2x32xf32>
    %145 = arith.truncf %144 : vector<2x32xf32> to vector<2x32xbf16>
    %c2_93 = arith.constant 2 : index
    %c0_94 = arith.constant 0 : index
    %c0_95 = arith.constant 0 : index
    %146 = vector.load %arg4[%c2_93, %c0_94, %c0_95] : memref<3x32x256xbf16, #tpu.memory_space<vmem>>, vector<1x32x256xbf16>
    %147 = vector.shape_cast %146 : vector<1x32x256xbf16> to vector<32x256xbf16>
    %148 = vector.extract_strided_slice %147 {offsets = [0, 0], sizes = [32, 192], strides = [1, 1]} : vector<32x256xbf16> to vector<32x192xbf16>
    %cst_96 = arith.constant dense<0.000000e+00> : vector<2x192xf32>
    %149 = tpu.matmul %145, %148, %cst_96 {dimension_numbers = #tpu.dot_dimension_numbers<[1], [0], [0], [1], [0, 0, 1, 1], [], []>} : vector<2x32xbf16>, vector<32x192xbf16>, vector<2x192xf32> -> vector<2x192xf32>
    %150 = vector.extract_strided_slice %149 {offsets = [0, 0], sizes = [1, 192], strides = [1, 1]} : vector<2x192xf32> to vector<1x192xf32>
    %151 = vector.broadcast %150 : vector<1x192xf32> to vector<2x192xf32>
    %152 = arith.mulf %112, %151 : vector<2x192xf32>
    %153 = vector.extract_strided_slice %149 {offsets = [1, 0], sizes = [1, 192], strides = [1, 1]} : vector<2x192xf32> to vector<1x192xf32>
    %154 = vector.broadcast %153 : vector<1x192xf32> to vector<2x192xf32>
    %155 = arith.addf %152, %154 : vector<2x192xf32>
    %cst_97 = arith.constant 0.000000e+00 : f32
    %156 = vector.broadcast %cst_97 : f32 to vector<2x192xf32>
    %157 = arith.cmpf oge, %155, %156 : vector<2x192xf32>
    %cst_98 = arith.constant 0.00999999977 : f32
    %158 = vector.broadcast %cst_98 : f32 to vector<2x192xf32>
    %159 = arith.mulf %158, %155 : vector<2x192xf32>
    %160 = arith.select %157, %155, %159 : vector<2x192xi1>, vector<2x192xf32>
    %161 = arith.truncf %160 : vector<2x192xf32> to vector<2x192xbf16>
    %c3 = arith.constant 3 : index
    %c0_99 = arith.constant 0 : index
    %c0_100 = arith.constant 0 : index
    %162 = vector.load %arg2[%c3, %c0_99, %c0_100] : memref<4x256x256xbf16, #tpu.memory_space<vmem>>, vector<1x256x256xbf16>
    %163 = vector.shape_cast %162 : vector<1x256x256xbf16> to vector<256x256xbf16>
    %164 = vector.extract_strided_slice %163 {offsets = [0, 0], sizes = [192, 192], strides = [1, 1]} : vector<256x256xbf16> to vector<192x192xbf16>
    %cst_101 = arith.constant dense<0.000000e+00> : vector<2x192xf32>
    %165 = tpu.matmul %161, %164, %cst_101 {dimension_numbers = #tpu.dot_dimension_numbers<[1], [0], [0], [1], [0, 0, 1, 1], [], []>} : vector<2x192xbf16>, vector<192x192xbf16>, vector<2x192xf32> -> vector<2x192xf32>
    %c1_102 = arith.constant 1 : index
    %c0_103 = arith.constant 0 : index
    %166 = vector.load %arg6[%c1_102, %c0_103] : memref<2x256xf32, #tpu.memory_space<vmem>>, vector<1x192xf32>
    %167 = vector.broadcast %166 : vector<1x192xf32> to vector<2x192xf32>
    %168 = arith.addf %165, %167 : vector<2x192xf32>
    %169 = math.tanh %168 : vector<2x192xf32>
    %c0_104 = arith.constant 0 : index
    %c0_105 = arith.constant 0 : index
    %170 = vector.load %arg7[%c0_104, %c0_105] : memref<2x192xf32, #tpu.memory_space<vmem>>, vector<2x192xf32>
    tpu.vector_store %arg7[%c0_104, %c0_105], %169 {strides = array<i32>} : memref<2x192xf32, #tpu.memory_space<vmem>>, vector<2x192xf32>,
    return
  }
  func.func @transform_0(%arg0: i32) -> (i32, i32) {
    %c0_i32 = arith.constant 0 : i32
    %c0_i32_0 = arith.constant 0 : i32
    %c0_i32_1 = arith.constant 0 : i32
    return %c0_i32, %c0_i32_0 : i32, i32
  }
  func.func @transform_1(%arg0: i32) -> (i32, i32, i32) {
    %c0_i32 = arith.constant 0 : i32
    %c0_i32_0 = arith.constant 0 : i32
    %c0_i32_1 = arith.constant 0 : i32
    %c0_i32_2 = arith.constant 0 : i32
    return %c0_i32, %c0_i32_0, %c0_i32_1 : i32, i32, i32
  }
  func.func @transform_2(%arg0: i32) -> (i32, i32, i32) {
    %c0_i32 = arith.constant 0 : i32
    %c0_i32_0 = arith.constant 0 : i32
    %c0_i32_1 = arith.constant 0 : i32
    %c0_i32_2 = arith.constant 0 : i32
    return %c0_i32, %c0_i32_0, %c0_i32_1 : i32, i32, i32
  }
  func.func @transform_3(%arg0: i32) -> (i32, i32, i32) {
    %c0_i32 = arith.constant 0 : i32
    %c0_i32_0 = arith.constant 0 : i32
    %c0_i32_1 = arith.constant 0 : i32
    %c0_i32_2 = arith.constant 0 : i32
    return %c0_i32, %c0_i32_0, %c0_i32_1 : i32, i32, i32
  }
  func.func @transform_4(%arg0: i32) -> (i32, i32, i32) {
    %c0_i32 = arith.constant 0 : i32
    %c0_i32_0 = arith.constant 0 : i32
    %c0_i32_1 = arith.constant 0 : i32
    %c0_i32_2 = arith.constant 0 : i32
    return %c0_i32, %c0_i32_0, %c0_i32_1 : i32, i32, i32
  }
  func.func @transform_5(%arg0: i32) -> (i32, i32) {
    %c0_i32 = arith.constant 0 : i32
    %c0_i32_0 = arith.constant 0 : i32
    %c0_i32_1 = arith.constant 0 : i32
    return %c0_i32, %c0_i32_0 : i32, i32
  }
  func.func @transform_6(%arg0: i32) -> (i32, i32) {
    %c0_i32 = arith.constant 0 : i32
    %c0_i32_0 = arith.constant 0 : i32
    %c0_i32_1 = arith.constant 0 : i32
    return %c0_i32, %c0_i32_0 : i32, i32
  }
}

</mosaic_0001>

<bundles_post_ra>
// kernel: forward.1
= control target key start
LH: loop header
LB: loop body
LE: loop exit
PB: predicated region body
PF: predicated region fallthrough
CT: control target
= control target key end

     0   :  { %11 = vsyncpa [#allocation4], 0  ;;  %s2130_s21 = smov [#allocation3]   ;;  %s2458_s0 = inlined_call_operand.vmem [shape: f32[2,8], index: 0, kind: input, shape index: {}]   ;;  %s2459_s1 = inlined_call_operand.hbm [shape: bf16[4,256,256], index: 1, kind: input, shape index: {}]   ;;  %s2460_s2 = inlined_call_operand.vmem [shape: bf16[3,256,32], index: 2, kind: input, shape index: {}]   ;;  %s2461_s3 = inlined_call_operand.vmem [shape: bf16[3,32,256], index: 3, kind: input, shape index: {}]   ;;  %s2462_s4 = inlined_call_operand.vmem [shape: f32[3,2,32], index: 4, kind: input, shape index: {}]   ;;  %s2463_s5 = inlined_call_operand.vmem [shape: f32[2,256], index: 5, kind: input, shape index: {}]   ;;  %s2464_s6 = inlined_call_operand.vmem [shape: f32[2,192], index: 6, kind: output, shape index: {}]  }
   0x1   :  { %s19_s22 = sshll.u32 %s2130_s21, 4  ;;  %s20_s22 = int_to_ptr.vmem [resolvable:$true] %s19_s22 }
   0x2   :  { %s2116_s23 = scalar_lea.vmem %s20_s22, 16384  ;;  %p2121_p1 = scmp.lt.s32.totalorder %s20_s22, %s20_s22 }
   0x3   :  { %p2117_p0 = scmp.ne.s32.totalorder %s20_s22, %s2116_s23  ;;  %p2122_p2 = scmp.lt.s32.totalorder %s2116_s23, %s2116_s23 }
   0x5   :  { %p2123_p3 = por %p2122_p2, %p2121_p1 }
   0x7   :  { %p2124_p4 = pnand %p2123_p3, %p2117_p0 }
   0x9   :  { %2127 = shalt.err (!%p2124_p4)
}
   0xa   :  { %s2131_s24 = smov 128   ;;  %s2132_s25 = smov 8  }
   0xb   :  { %25 = dma.hbm_to_vmem [thread:$0]  %s2459_s1, 16384, %s20_s22, [#allocation4], %s2131_s24, %s2131_s24, %s2132_s25  }
   0xc   :  { %2128 = dma.done.wait [#allocation4], 16384  }
   0xd   :  { %2129 = vsyncadd [#allocation4], 4294950912  ;;  %v2133_v0 = vmov 0.0   ;;  %vm2134_vm0 = vmmov 0   ;;  %vm50_vm1 = vcmask 1043456   ;;  %v39_v1 = vld [vmem:[#allocation3] sm:$0xff]  ;;  %v242_v59 = vlaneseq }
   0xe   :  { %1898 = vmatprep.subr.bf16.mxu0 %v2133_v0  ;;  %1900 = vmatprep.mubr.msk.bf16.mxu0 %vm2134_vm0, %v2133_v0  ;;  %v38_v2 = vld [vmem:[%s2458_s0] sm:$0x3]  ;;  %v52_v3 = vsel %vm50_vm1, %v39_v1, 0  ;;  %vm46_vm2 = vcmask 64512   ;;  %v1940_v5 = vld [vmem:[%s2460_s2 + $0x38] sm:$0xff]   ;;  %v1941_v6 = vld [vmem:[%s2460_s2 + $0x30] sm:$0xff]  }
   0xf   :  { %1904 = vmatprep.subr.bf16.mxu1 %v2133_v0  ;;  %1920 = vmatprep.mubr.msk.bf16.mxu1 %vm2134_vm0, %v2133_v0  ;;  %v40_v4 = vpack.c.bf16 %v38_v2, %v38_v2  ;;  %v1942_v7 = vld [vmem:[%s2460_s2 + $0x28] sm:$0xff]   ;;  %v1943_v8 = vld [vmem:[%s2460_s2 + $0x20] sm:$0xff]   ;;  %v1944_v9 = vld [vmem:[%s2460_s2 + $0x18] sm:$0xff]   ;;  %vm94_vm3 = vcmask 1041408   ;;  %v2135_v57 = vmov 1983009808  }
  0x10   :  { %1899 = vmatpush3.bf16.msra.mxu0 %v52_v3  ;;  %1905 = vmatpush3.bf16.msra.mxu1 %v1940_v5  ;;  %v1945_v10 = vld [vmem:[%s2460_s2 + $0x10] sm:$0xff]   ;;  %v1946_v11 = vld [vmem:[%s2460_s2 + $0x8] sm:$0xff]   ;;  %v1947_v12 = vld [vmem:[%s2460_s2] sm:$0xff]   ;;  %v240_v58 = vunpack.c.l.s4 %v2135_v57  ;;  %vm236_vm4 = vcmask 253952   ;;  %v2240_v1 = vshrl.u32 %v242_v59, 7  ;;  %vm268_vm5 = vcmask 261120  }
  0x11   :  { %1924 = vmatprep.subr.bf16.mxu0 %v2133_v0  ;;  %1906 = vmatprep.subr.bf16.mxu1 %v2133_v0  ;;  %v1665_v13 = vld [vmem:[%s2463_s5] ss:$0 sm:$0xff]  ;;  %v1948_v36 = vld [vmem:[%s2461_s3 + $0x10] ss:$8 sps:$4 sm:$0xff]   ;;  %v1950_v38 = vld [vmem:[#allocation3 + $0x170] ss:$8 sps:$4 sm:$0xff]  }
  0x12   :  { %v1949_v37 = vld [vmem:[%s2461_s3] ss:$8 sps:$4 sm:$0xff]   ;;  %v1953_v41 = vld [vmem:[#allocation3 + $0x160] ss:$8 sps:$4 sm:$0xff]   ;;  %v1956_v43 = vld [vmem:[#allocation3 + $0x150] ss:$8 sps:$4 sm:$0xff]  }
  0x13   :  { %1901 = vmatmul.mubr.msk.bf16.vlgmr.msra.gmra.mxu0 %vm46_vm2, %v40_v4  ;;  %v1952_v39 = vld [vmem:[#allocation3 + $0x174] ss:$8 sps:$4 sm:$0xff]   ;;  %v1955_v40 = vld [vmem:[#allocation3 + $0x164] ss:$8 sps:$4 sm:$0xff]   ;;  %v1959_v45 = vld [vmem:[#allocation3 + $0x140] ss:$8 sps:$4 sm:$0xff]  }
  0x14   :  { %1928 = vmatprep.mubr.msk.bf16.mxu0 %vm2134_vm0, %v2133_v0  ;;  %1907 = vmatpush3.bf16.msra.mxu1 %v1941_v6  ;;  %v1958_v42 = vld [vmem:[#allocation3 + $0x154] ss:$8 sps:$4 sm:$0xff]   ;;  %v1961_v44 = vld [vmem:[#allocation3 + $0x144] ss:$8 sps:$4 sm:$0xff]   ;;  %v1962_v47 = vld [vmem:[#allocation3 + $0x130] ss:$8 sps:$4 sm:$0xff]  }
  0x15   :  { %1908 = vmatprep.subr.bf16.mxu1 %v2133_v0  ;;  %1925 = vmatpush3.bf16.msra.mxu0 %v1948_v36  ;;  %v1964_v46 = vld [vmem:[#allocation3 + $0x134] ss:$8 sps:$4 sm:$0xff]   ;;  %vm498_vm7 = vcmp.lt.s32.totalorder %v242_v59, 256  ;;  %vm1092_vm10 = vcmask 517120   ;;  %vm1118_vm11 = vcmp.lt.s32.totalorder %v242_v59, 192  ;;  %vm1267_vm12 = vcmask 523264  }
  0x16   :  { %1926 = vmatprep.subr.bf16.mxu0 %v2133_v0  ;;  %v224_v61 = vld [vmem:[%s2462_s4] sm:$0x3]  ;;  %v2056_v59 = vld [vmem:[%s2461_s3 + $0x50] ss:$8 sps:$4 sm:$0xff]   ;;  %vm1657_vm15 = vcmask 519170  }
  0x17   :  { %v1980_v36 = vld [vmem:[%s2460_s2 + $0xe0] sm:$0xff]   ;;  %vm1658_vm0 = vmor %vm1657_vm15, %vm94_vm3 }
  0x18   :  { %1909 = vmatpush3.bf16.msra.mxu1 %v1942_v7 }
  0x19   :  { %1910 = vmatprep.subr.bf16.mxu1 %v2133_v0  ;;  %1927 = vmatpush3.bf16.msra.mxu0 %v1949_v37  ;;  %v1981_v37 = vld [vmem:[%s2460_s2 + $0xa0] sm:$0xff]  }
  0x1c   :  { %1911 = vmatpush3.bf16.msra.mxu1 %v1943_v8 }
  0x1d   :  { %1912 = vmatprep.subr.bf16.mxu1 %v2133_v0 }
  0x20   :  { %1913 = vmatpush3.bf16.msra.mxu1 %v1944_v9 }
  0x21   :  { %1914 = vmatprep.subr.bf16.mxu1 %v2133_v0 }
  0x24   :  { %1915 = vmatpush3.bf16.msra.mxu1 %v1945_v10  ;;  %v1967_v10 = vld [vmem:[#allocation3 + $0x124] ss:$8 sps:$4 sm:$0xff]  }
  0x25   :  { %1916 = vmatprep.subr.bf16.mxu1 %v2133_v0 }
  0x28   :  { %1917 = vmatpush3.bf16.msra.mxu1 %v1946_v11  ;;  %v1965_v11 = vld [vmem:[#allocation3 + $0x120] ss:$8 sps:$4 sm:$0xff]  }
  0x29   :  { %1918 = vmatprep.subr.bf16.mxu1 %v2133_v0  ;;  %v241_v0 = vunpack.c.0.s8 %v240_v58  ;;  %v2137_v58 = vmov 1966171168  }
  0x2b   :  { %v2244_v4 = vsub.s32 %v241_v0, %v2240_v1 }
  0x2c   :  { %1919 = vmatpush3.bf16.msra.mxu1 %v1947_v12  ;;  %v1970_v12 = vld [vmem:[#allocation3 + $0x114] ss:$8 sps:$4 sm:$0xff]  }
  0x2d   :  { %423 = vmatprep.subr.bf16.mxu1 %v1952_v39  ;;  %v1983_v39 = vld [vmem:[%s2460_s2 + $0x98] sm:$0xff]  }
  0xd3   :  { %v88_v14 = vpop.f32.mrf.mxu0 }
  0xd4   :  { %v2222_v15 = vadd.f32 %v1665_v13, %v88_v14  ;;  %v1968_v13 = vld [vmem:[#allocation3 + $0x110] ss:$8 sps:$4 sm:$0xff]   ;;  %v1973_v14 = vld [vmem:[#allocation3 + $0x104] ss:$8 sps:$4 sm:$0xff]  }
  0xd5   :  { %v1902_v16 = vpop.f32.mrf.mxu0 }
  0xd6   :  { %v95_v17 = vsel %vm94_vm3, %v2222_v15, 0.0  ;;  %v103_v18 = vmul.f32 %v2222_v15, %v2222_v15  ;;  %v1971_v16 = vld [vmem:[#allocation3 + $0x100] ss:$8 sps:$4 sm:$0xff]  }
  0xd7   :  { %v96_v19 = vrot.slane %v95_v17, 4  ;;  %v91_v20 = vpop.f32.mrf.mxu0 }
  0xd8   :  { %v104_v21 = vsel %vm94_vm3, %v103_v18, 0.0  ;;  %v2252_v18 = vsub.s32 0, %v2240_v1 }
  0xd9   :  { %v97_v22 = vadd.f32 %v96_v19, %v95_v17  ;;  %v105_v23 = vrot.slane %v104_v21, 4  ;;  %v1903_v24 = vpop.f32.mrf.mxu0  ;;  %v2136_v17 = vmov 0   ;;  %v2255_v19 = vsub.s32 1, %v2240_v1 }
  0xdb   :  { %v98_v25 = vrot.slane %v97_v22, 2  ;;  %v106_v26 = vadd.f32 %v105_v23, %v104_v21 }
  0xdd   :  { %v99_v27 = vadd.f32 %v98_v25, %v97_v22  ;;  %v107_v28 = vrot.slane %v106_v26, 2 }
  0xdf   :  { %v100_v29 = vrot.slane %v99_v27, 1  ;;  %v108_v30 = vadd.f32 %v107_v28, %v106_v26 }
  0xe1   :  { %v101_v31 = vadd.f32 %v100_v29, %v99_v27  ;;  %v109_v32 = vrot.slane %v108_v30, 1 }
  0xe3   :  { %102 = vst [vmem:[#allocation2] sm:$0x1] %v101_v31  ;;  %v110_v33 = vadd.f32 %v109_v32, %v108_v30  ;;  %v1974_v31 = vld [vmem:[%s2460_s2 + $0xf8] sm:$0xff]  }
  0xe4   :  { %v1975_v32 = vld [vmem:[%s2460_s2 + $0xb8] sm:$0xff]  }
  0xe5   :  { %111 = vst [vmem:[#allocation2 + $0x1] sm:$0x1] %v110_v33  ;;  %v1977_v33 = vld [vmem:[%s2460_s2 + $0xb0] sm:$0xff]  }
  0xec   :  { %v112_v34 = vld [vmem:[#allocation2] sm:$0x3] }
  0xed   :  { %v113_v35 = vpack.c.bf16 %v112_v34, %v112_v34  ;;  %v1978_v34 = vld [vmem:[%s2460_s2 + $0xe8] sm:$0xff]  }
  0xef   :  { %1921 = vmatmul.mubr.bf16.vlgmr.msra.gmra.mxu1 %v113_v35  ;;  %v1979_v35 = vld [vmem:[%s2460_s2 + $0xa8] sm:$0xff]  }
  0xf0   :  { %424 = vmatpush1.bf16.msra.mxu1 %v1950_v38  ;;  %455 = vmatprep.mubr.bf16.mxu1 %v2136_v17  ;;  %v1982_v38 = vld [vmem:[%s2460_s2 + $0xd8] sm:$0xff]  }
  0xf1   :  { %425 = vmatprep.subr.bf16.mxu1 %v1955_v40  ;;  %v1984_v40 = vld [vmem:[%s2460_s2 + $0xd0] sm:$0xff]  }
  0xf4   :  { %426 = vmatpush1.bf16.msra.mxu1 %v1953_v41  ;;  %v1985_v41 = vld [vmem:[%s2460_s2 + $0x90] sm:$0xff]  }
  0xf5   :  { %427 = vmatprep.subr.bf16.mxu1 %v1958_v42  ;;  %v1986_v42 = vld [vmem:[%s2460_s2 + $0xc8] sm:$0xff]  }
  0xf8   :  { %428 = vmatpush1.bf16.msra.mxu1 %v1956_v43  ;;  %v1987_v43 = vld [vmem:[%s2460_s2 + $0x88] sm:$0xff]  }
  0xf9   :  { %429 = vmatprep.subr.bf16.mxu1 %v1961_v44  ;;  %v1988_v44 = vld [vmem:[%s2460_s2 + $0xc0] sm:$0xff]  }
  0xfc   :  { %430 = vmatpush1.bf16.msra.mxu1 %v1959_v45  ;;  %v1989_v45 = vld [vmem:[%s2460_s2 + $0x80] sm:$0xff]  }
  0xfd   :  { %431 = vmatprep.subr.bf16.mxu1 %v1964_v46 }
 0x100   :  { %432 = vmatpush1.bf16.msra.mxu1 %v1962_v47 }
 0x101   :  { %433 = vmatprep.subr.bf16.mxu1 %v1967_v10 }
 0x104   :  { %434 = vmatpush1.bf16.msra.mxu1 %v1965_v11 }
 0x105   :  { %435 = vmatprep.subr.bf16.mxu1 %v1970_v12 }
 0x108   :  { %436 = vmatpush1.bf16.msra.mxu1 %v1968_v13 }
 0x109   :  { %437 = vmatprep.subr.bf16.mxu1 %v1973_v14 }
 0x10c   :  { %438 = vmatpush1.bf16.msra.mxu1 %v1971_v16 }
 0x10d   :  { %1876 = vmatprep.subr.bf16.mxu1 %v1974_v31 }
 0x1af   :  { %v212_v48 = vpop.f32.mrf.mxu1 }
 0x1b0   :  { %v218_v49 = vmul.f32 0.5, %v212_v48 }
 0x1b1   :  { %v1922_v50 = vpop.f32.mrf.mxu1 }
 0x1b2   :  { %v219_v51 = vmul.f32 %v218_v49, %v218_v49 }
 0x1b3   :  { %v215_v52 = vpop.f32.mrf.mxu1 }
 0x1b4   :  { %v221_v53 = vrot.slane %v219_v51, 7 }
 0x1b5   :  { %v1923_v54 = vpop.f32.mrf.mxu1 }
 0x1b6   :  { %v223_v55 = vsub.f32 %v218_v49, %v221_v53 }
 0x1b8   :  { %v225_v56 = vadd.f32 1e-05, %v223_v55 }
 0x1ba   :  { %2098 = vrsqrt.f32 %v225_v56 }
 0x1c7   :  { %v2099_v60 = vpop.eup %2098 }
 0x1c8   :  { %v228_v62 = vrot.slane %v2099_v60, 1  ;;  %v482_v60 = vunpack.c.l.s4 %v2137_v58 }
 0x1ca   :  { %v230_v63 = vmul.f32 %v228_v62, %v224_v61 }
 0x1cc   :  { %v231_v2 = vmul.f32 %v230_v63, %v218_v49  ;;  %237 = vst.msk [vmem:[#allocation2] sm:$0x1] %vm236_vm4, %v230_v63 }
 0x1ce   :  { %v233_v3 = vrot.slane %v231_v2, 7 }
 0x1d0   :  { %v235_v5 = vsub.f32 %v224_v61, %v233_v3 }
 0x1d2   :  { %v245_v6 = vrot.slane %v235_v5, %v2244_v4 }
 0x1d4   :  { %v1675_v7 = vrot.slane %v245_v6, 9 }
 0x1d6   :  { %249 = vst.msk [vmem:[#allocation2 + $0x1] sm:$0x1] %vm236_vm4, %v1675_v7 }
 0x1dd   :  { %v250_v8 = vld [vmem:[#allocation2] sm:$0x3] }
 0x1de   :  { %v251_v9 = vpack.c.bf16 %v250_v8, %v250_v8 }
 0x1e0   :  { %1929 = vmatmul.mubr.msk.bf16.vlgmr.msra.gmra.mxu0 %vm268_vm5, %v251_v9  ;;  %v483_v9 = vunpack.c.0.s8 %v482_v60 }
 0x1e1   :  { %814 = vmatprep.mubr.bf16.mxu0 %v2136_v17 }
 0x2a0   :  { %v306_v20 = vpop.f32.mrf.mxu0 }
 0x2a1   :  { %v315_v21 = vrot.slane %v306_v20, %v2252_v18  ;;  %v320_v24 = vrot.slane %v306_v20, %v2255_v19 }
 0x2a2   :  { %v1930_v22 = vpop.f32.mrf.mxu0 }
 0x2a3   :  { %v316_v23 = vmul.f32 %v315_v21, %v2222_v15  ;;  %v1976_v15 = vld [vmem:[%s2460_s2 + $0xf0] sm:$0xff]   ;;  %v2324_v21 = vsub.s32 %v483_v9, %v2240_v1  ;;  %v2010_v9 = vld [vmem:[#allocation3 + $0x234] ss:$8 sps:$4 sm:$0xff]  }
 0x2a4   :  { %v309_v25 = vpop.f32.mrf.mxu0 }
 0x2a5   :  { %v321_v26 = vadd.f32 %v320_v24, %v316_v23 }
 0x2a6   :  { %v1931_v27 = vpop.f32.mrf.mxu0 }
 0x2a7   :  { %vm322_vm6 = vcmp.ge.f32.partialorder %v321_v26, 0.0  ;;  %v323_v28 = vmul.f32 0.01, %v321_v26 }
 0x2a9   :  { %v324_v29 = vsel %vm322_vm6, %v321_v26, %v323_v28 }
 0x2aa   :  { %v342_v30 = vpack.c.bf16 %v324_v29, %v324_v29 }
 0x2ac   :  { %456 = vmatmul.mubr.bf16.vlgmr.msra.gmra.mxu1 %v342_v30 }
 0x2ad   :  { %1877 = vmatpush3.bf16.msra.mxu1 %v1975_v32 }
 0x2ae   :  { %1878 = vmatprep.subr.bf16.mxu1 %v1976_v15 }
 0x2b1   :  { %1879 = vmatpush3.bf16.msra.mxu1 %v1977_v33 }
 0x2b2   :  { %1880 = vmatprep.subr.bf16.mxu1 %v1978_v34 }
 0x2b5   :  { %1881 = vmatpush3.bf16.msra.mxu1 %v1979_v35  ;;  %v1990_v35 = vld [vmem:[%s2461_s3 + $0x30] ss:$8 sps:$4 sm:$0xff]  }
 0x2b6   :  { %1882 = vmatprep.subr.bf16.mxu1 %v1980_v36  ;;  %v1992_v36 = vld [vmem:[%s2461_s3 + $0x34] ss:$8 sps:$4 sm:$0xff]  }
 0x2b7   :  { %794 = vmatprep.subr.bf16.mxu0 %v1992_v36  ;;  %v2044_v36 = vld [vmem:[%s2460_s2 + $0x138] sm:$0xff]  }
 0x2b8   :  { %795 = vmatpush1.bf16.msra.mxu0 %v1990_v35  ;;  %v2043_v35 = vld [vmem:[#allocation3 + $0x284] ss:$8 sps:$4 sm:$0xff]  }
 0x2b9   :  { %1883 = vmatpush3.bf16.msra.mxu1 %v1981_v37  ;;  %v1995_v37 = vld [vmem:[%s2461_s3 + $0x24] ss:$8 sps:$4 sm:$0xff]  }
 0x2ba   :  { %1884 = vmatprep.subr.bf16.mxu1 %v1982_v38  ;;  %v1993_v38 = vld [vmem:[%s2461_s3 + $0x20] ss:$8 sps:$4 sm:$0xff]   ;;  %796 = vmatprep.subr.bf16.mxu0 %v1995_v37  ;;  %v2045_v37 = vld [vmem:[%s2460_s2 + $0x130] sm:$0xff]  }
 0x2bc   :  { %797 = vmatpush1.bf16.msra.mxu0 %v1993_v38  ;;  %v2046_v38 = vld [vmem:[%s2460_s2 + $0x128] sm:$0xff]  }
 0x2bd   :  { %1885 = vmatpush3.bf16.msra.mxu1 %v1983_v39  ;;  %v1998_v39 = vld [vmem:[#allocation3 + $0x274] ss:$8 sps:$4 sm:$0xff]  }
 0x2be   :  { %1886 = vmatprep.subr.bf16.mxu1 %v1984_v40  ;;  %1044 = vmatprep.subr.bf16.mxu0 %v1998_v39 }
 0x2c1   :  { %1887 = vmatpush3.bf16.msra.mxu1 %v1985_v41 }
 0x2c2   :  { %1888 = vmatprep.subr.bf16.mxu1 %v1986_v42 }
 0x2c5   :  { %1889 = vmatpush3.bf16.msra.mxu1 %v1987_v43 }
 0x2c6   :  { %1890 = vmatprep.subr.bf16.mxu1 %v1988_v44 }
 0x2c9   :  { %1891 = vmatpush3.bf16.msra.mxu1 %v1989_v45 }
 0x2ca   :  { %1271 = vmatprep.subr.bf16.mxu1 %v2136_v17 }
 0x36c   :  { %v2309_v46 = vpop.f32.mrf.mxu1 }
 0x36d   :  { %v464_v47 = vsel %vm94_vm3, %v2309_v46, 0.0  ;;  %v501_v48 = vmul.f32 %v2309_v46, %v2309_v46 }
 0x36e   :  { %v465_v49 = vrot.slane %v464_v47, 4  ;;  %v2315_v50 = vpop.f32.mrf.mxu1 }
 0x36f   :  { %v503_v51 = vsel %vm94_vm3, %v501_v48, 0.0  ;;  %v471_v52 = vsel %vm94_vm3, %v2315_v50, 0.0  ;;  %v502_v53 = vmul.f32 %v2315_v50, %v2315_v50 }
 0x370   :  { %v466_v54 = vadd.f32 %v465_v49, %v464_v47  ;;  %v504_v55 = vrot.slane %v503_v51, 4  ;;  %v472_v56 = vrot.slane %v471_v52, 4  ;;  %v461_v57 = vpop.f32.mrf.mxu1 }
 0x371   :  { %v510_v61 = vsel %vm94_vm3, %v502_v53, 0.0  ;;  %v1744_v53 = vld [vmem:[%s2462_s4 + $0x2] sm:$0x3] }
 0x372   :  { %v467_v62 = vrot.slane %v466_v54, 2  ;;  %v505_v63 = vadd.f32 %v504_v55, %v503_v51  ;;  %v473_v0 = vadd.f32 %v472_v56, %v471_v52  ;;  %v511_v2 = vrot.slane %v510_v61, 4  ;;  %v462_v3 = vpop.f32.mrf.mxu1 }
 0x373   :  { %v1999_v3 = vld [vmem:[#allocation3 + $0x260] ss:$8 sps:$4 sm:$0xff]  }
 0x374   :  { %v468_v5 = vadd.f32 %v467_v62, %v466_v54  ;;  %v506_v6 = vrot.slane %v505_v63, 2  ;;  %v474_v7 = vrot.slane %v473_v0, 2  ;;  %v512_v8 = vadd.f32 %v511_v2, %v510_v61  ;;  %v2001_v2 = vld [vmem:[#allocation3 + $0x264] ss:$8 sps:$4 sm:$0xff]  }
 0x376   :  { %v469_v10 = vrot.slane %v468_v5, 1  ;;  %v507_v11 = vadd.f32 %v506_v6, %v505_v63  ;;  %v475_v12 = vadd.f32 %v474_v7, %v473_v0  ;;  %v513_v13 = vrot.slane %v512_v8, 2  ;;  %v1996_v63 = vld [vmem:[#allocation3 + $0x270] ss:$8 sps:$4 sm:$0xff]   ;;  %v2007_v7 = vld [vmem:[#allocation3 + $0x244] ss:$8 sps:$4 sm:$0xff]  }
 0x377   :  { %v2002_v6 = vld [vmem:[#allocation3 + $0x250] ss:$8 sps:$4 sm:$0xff]  }
 0x378   :  { %v508_v14 = vrot.slane %v507_v11, 1  ;;  %v476_v16 = vrot.slane %v475_v12, 1  ;;  %v514_v20 = vadd.f32 %v513_v13, %v512_v8  ;;  %v470_v22 = vadd.f32 %v469_v10, %v468_v5  ;;  %v2004_v5 = vld [vmem:[#allocation3 + $0x254] ss:$8 sps:$4 sm:$0xff]   ;;  %v2005_v8 = vld [vmem:[#allocation3 + $0x240] ss:$8 sps:$4 sm:$0xff]  }
 0x379   :  { %v2008_v10 = vld [vmem:[#allocation3 + $0x230] ss:$8 sps:$4 sm:$0xff]   ;;  %v2016_v13 = vld [vmem:[#allocation3 + $0x214] ss:$8 sps:$4 sm:$0xff]  }
 0x37a   :  { %v477_v23 = vadd.f32 %v476_v16, %v475_v12  ;;  %v515_v24 = vrot.slane %v514_v20, 1  ;;  %v509_v25 = vadd.f32 %v508_v14, %v507_v11  ;;  %v2013_v11 = vld [vmem:[#allocation3 + $0x224] ss:$8 sps:$4 sm:$0xff]   ;;  %v2011_v12 = vld [vmem:[#allocation3 + $0x220] ss:$8 sps:$4 sm:$0xff]  }
 0x37b   :  { %v2014_v14 = vld [vmem:[#allocation3 + $0x210] ss:$8 sps:$4 sm:$0xff]   ;;  %v2019_v16 = vld [vmem:[#allocation3 + $0x204] ss:$8 sps:$4 sm:$0xff]  }
 0x37c   :  { %v480_v26 = vcombine.low %v470_v22, %v477_v23  ;;  %v516_v27 = vadd.f32 %v515_v24, %v514_v20  ;;  %v2017_v20 = vld [vmem:[#allocation3 + $0x200] ss:$8 sps:$4 sm:$0xff]   ;;  %v2022_v22 = vld [vmem:[#allocation3 + $0x2f4] ss:$8 sps:$4 sm:$0xff]   ;;  %v2020_v23 = vld [vmem:[#allocation3 + $0x2f0] ss:$8 sps:$4 sm:$0xff]  }
 0x37d   :  { %v2025_v24 = vld [vmem:[#allocation3 + $0x2e4] ss:$8 sps:$4 sm:$0xff]  }
 0x37e   :  { %v487_v28 = vrot.slane %v480_v26, %v2324_v21  ;;  %v519_v29 = vcombine.low %v509_v25, %v516_v27  ;;  %v2023_v25 = vld [vmem:[#allocation3 + $0x2e0] ss:$8 sps:$4 sm:$0xff]   ;;  %v2028_v26 = vld [vmem:[#allocation3 + $0x2d4] ss:$8 sps:$4 sm:$0xff]   ;;  %v2026_v27 = vld [vmem:[#allocation3 + $0x2d0] ss:$8 sps:$4 sm:$0xff]  }
 0x380   :  { %v494_v30 = vrot.slane %v487_v28, %v2324_v21  ;;  %v526_v31 = vrot.slane %v519_v29, %v2324_v21  ;;  %v2031_v28 = vld [vmem:[#allocation3 + $0x2c4] ss:$8 sps:$4 sm:$0xff]   ;;  %v2029_v29 = vld [vmem:[#allocation3 + $0x2c0] ss:$8 sps:$4 sm:$0xff]  }
 0x382   :  { %500 = vst.msk [vmem:[#allocation2] ss:$2 sm:$0x3] %vm498_vm7, %v494_v30  ;;  %v533_v32 = vrot.slane %v526_v31, %v2324_v21  ;;  %v2034_v30 = vld [vmem:[#allocation3 + $0x2b4] ss:$8 sps:$4 sm:$0xff]  }
 0x383   :  { %v2032_v31 = vld [vmem:[#allocation3 + $0x2b0] ss:$8 sps:$4 sm:$0xff]  }
 0x384   :  { %536 = vst.msk [vmem:[#allocation2 + $0x1] ss:$2 sm:$0x3] %vm498_vm7, %v533_v32  ;;  %v2037_v32 = vld [vmem:[#allocation3 + $0x2a4] ss:$8 sps:$4 sm:$0xff]  }
 0x38b   :  { %v1695_v1 = vld.sshfl [vmem:[#allocation2] sm:$0x33 pattern:$0x76325410] }
 0x38c   :  { %v546_v15 = vcombine.high %v1695_v1, %v1695_v1  ;;  %v549_v34 = vpack.c.bf16 %v1695_v1, %v1695_v1  ;;  %v2035_v1 = vld [vmem:[#allocation3 + $0x2a0] ss:$8 sps:$4 sm:$0xff]  }
 0x38e   :  { %v550_v33 = vpack.c.bf16 %v546_v15, %v546_v15  ;;  %v2040_v15 = vld [vmem:[#allocation3 + $0x294] ss:$8 sps:$4 sm:$0xff]  }
 0x390   :  { %712 = vmatprep.mubr.bf16.mxu1 %v550_v33  ;;  %v2038_v33 = vld [vmem:[#allocation3 + $0x290] ss:$8 sps:$4 sm:$0xff]  }
 0x391   :  { %713 = vmatmul.mubr.bf16.vlgmr.msra.gmra.mxu1 %v549_v34  ;;  %v2041_v34 = vld [vmem:[#allocation3 + $0x280] ss:$8 sps:$4 sm:$0xff]  }
 0x392   :  { %1272 = vmatpush1.bf16.msra.mxu1 %v2044_v36 }
 0x393   :  { %1273 = vmatprep.subr.bf16.mxu1 %v2136_v17 }
 0x396   :  { %1274 = vmatpush1.bf16.msra.mxu1 %v2045_v37 }
 0x397   :  { %1275 = vmatprep.subr.bf16.mxu1 %v2136_v17 }
 0x39a   :  { %1276 = vmatpush1.bf16.msra.mxu1 %v2046_v38 }
 0x39b   :  { %1277 = vmatprep.subr.bf16.mxu1 %v2136_v17 }
 0x451   :  { %v1892_v40 = vpop.f32.mrf.mxu1 }
 0x453   :  { %v1893_v41 = vpop.f32.mrf.mxu1 }
 0x454   :  { %v1894_v42 = vadd.f32 %v1893_v41, %v1892_v40 }
 0x455   :  { %v1895_v43 = vpop.f32.mrf.mxu1 }
 0x456   :  { %v720_v44 = vmul.f32 0.5, %v1894_v42 }
 0x457   :  { %v1896_v45 = vpop.f32.mrf.mxu1 }
 0x458   :  { %v721_v47 = vmul.f32 %v720_v44, %v720_v44 }
 0x45a   :  { %v723_v48 = vrot.slane %v721_v47, 7 }
 0x45c   :  { %v725_v49 = vsub.f32 %v720_v44, %v723_v48 }
 0x45e   :  { %v728_v51 = vadd.f32 1e-05, %v725_v49 }
 0x460   :  { %2100 = vrsqrt.f32 %v728_v51 }
 0x46d   :  { %v2101_v52 = vpop.eup %2100 }
 0x46e   :  { %v731_v54 = vrot.slane %v2101_v52, 1 }
 0x470   :  { %v733_v55 = vmul.f32 %v1744_v53, %v731_v54 }
 0x472   :  { %v734_v56 = vmul.f32 %v733_v55, %v720_v44  ;;  %739 = vst.msk [vmem:[#allocation2] sm:$0x1] %vm236_vm4, %v733_v55 }
 0x474   :  { %v736_v57 = vrot.slane %v734_v56, 7 }
 0x476   :  { %v738_v58 = vsub.f32 %v1744_v53, %v736_v57 }
 0x478   :  { %v747_v60 = vrot.slane %v738_v58, %v2244_v4  ;;  %v2048_v58 = vld [vmem:[%s2460_s2 + $0x118] sm:$0xff]  }
 0x47a   :  { %v1745_v61 = vrot.slane %v747_v60, 9  ;;  %v2049_v60 = vld [vmem:[%s2460_s2 + $0x110] sm:$0xff]  }
 0x47c   :  { %751 = vst.msk [vmem:[#allocation2 + $0x1] sm:$0x1] %vm236_vm4, %v1745_v61  ;;  %v2050_v61 = vld [vmem:[%s2460_s2 + $0x108] sm:$0xff]  }
 0x483   :  { %v752_v62 = vld [vmem:[#allocation2] sm:$0x3] }
 0x484   :  { %v753_v0 = vpack.c.bf16 %v752_v62, %v752_v62  ;;  %v2051_v62 = vld [vmem:[%s2460_s2 + $0x100] sm:$0xff]  }
 0x486   :  { %1754 = vmatmul.mubr.msk.bf16.vlgmr.msra.gmra.mxu0 %vm268_vm5, %v753_v0  ;;  %v2053_v0 = vld [vmem:[%s2460_s2 + $0x150] sm:$0xff]  }
 0x487   :  { %1045 = vmatpush1.bf16.msra.mxu0 %v1996_v63  ;;  %v2052_v63 = vld [vmem:[%s2460_s2 + $0x158] sm:$0xff]  }
 0x488   :  { %1046 = vmatprep.subr.bf16.mxu0 %v2001_v2  ;;  %v2054_v2 = vld [vmem:[%s2460_s2 + $0x148] sm:$0xff]  }
 0x48b   :  { %1047 = vmatpush1.bf16.msra.mxu0 %v1999_v3  ;;  %v2055_v3 = vld [vmem:[%s2460_s2 + $0x140] sm:$0xff]  }
 0x48c   :  { %1048 = vmatprep.subr.bf16.mxu0 %v2004_v5 }
 0x48f   :  { %1049 = vmatpush1.bf16.msra.mxu0 %v2002_v6 }
 0x490   :  { %1050 = vmatprep.subr.bf16.mxu0 %v2007_v7 }
 0x493   :  { %1051 = vmatpush1.bf16.msra.mxu0 %v2005_v8 }
 0x494   :  { %1052 = vmatprep.subr.bf16.mxu0 %v2010_v9 }
 0x497   :  { %1053 = vmatpush1.bf16.msra.mxu0 %v2008_v10 }
 0x498   :  { %1054 = vmatprep.subr.bf16.mxu0 %v2013_v11 }
 0x49b   :  { %1055 = vmatpush1.bf16.msra.mxu0 %v2011_v12 }
 0x49c   :  { %1056 = vmatprep.subr.bf16.mxu0 %v2016_v13 }
 0x49f   :  { %1057 = vmatpush1.bf16.msra.mxu0 %v2014_v14 }
 0x4a0   :  { %1058 = vmatprep.subr.bf16.mxu0 %v2019_v16 }
 0x4a3   :  { %1059 = vmatpush1.bf16.msra.mxu0 %v2017_v20 }
 0x4a4   :  { %1060 = vmatprep.subr.bf16.mxu0 %v2022_v22 }
 0x4a7   :  { %1061 = vmatpush2.bf16.msra.mxu0 %v2020_v23 }
 0x4a8   :  { %1062 = vmatprep.subr.bf16.mxu0 %v2025_v24 }
 0x4ab   :  { %1063 = vmatpush2.bf16.msra.mxu0 %v2023_v25 }
 0x4ac   :  { %1064 = vmatprep.subr.bf16.mxu0 %v2028_v26 }
 0x4af   :  { %1065 = vmatpush2.bf16.msra.mxu0 %v2026_v27 }
 0x4b0   :  { %1066 = vmatprep.subr.bf16.mxu0 %v2031_v28 }
 0x4b3   :  { %1067 = vmatpush2.bf16.msra.mxu0 %v2029_v29 }
 0x4b4   :  { %1068 = vmatprep.subr.bf16.mxu0 %v2034_v30 }
 0x4b7   :  { %1069 = vmatpush2.bf16.msra.mxu0 %v2032_v31 }
 0x4b8   :  { %1070 = vmatprep.subr.bf16.mxu0 %v2037_v32 }
 0x4bb   :  { %1071 = vmatpush2.bf16.msra.mxu0 %v2035_v1 }
 0x4bc   :  { %1072 = vmatprep.subr.bf16.mxu0 %v2040_v15 }
 0x4bf   :  { %1073 = vmatpush2.bf16.msra.mxu0 %v2038_v33 }
 0x4c0   :  { %1074 = vmatprep.subr.bf16.mxu0 %v2043_v35 }
 0x4c3   :  { %1075 = vmatpush2.bf16.msra.mxu0 %v2041_v34 }
 0x546   :  { %v816_v39 = vpop.f32.mrf.mxu0 }
 0x547   :  { %v826_v40 = vrot.slane %v816_v39, %v2252_v18  ;;  %v836_v43 = vrot.slane %v816_v39, %v2255_v19 }
 0x548   :  { %v818_v41 = vpop.f32.mrf.mxu0 }
 0x549   :  { %v831_v42 = vmul.f32 %v826_v40, %v2309_v46  ;;  %v830_v44 = vrot.slane %v818_v41, %v2252_v18  ;;  %v840_v49 = vrot.slane %v818_v41, %v2255_v19 }
 0x54a   :  { %v820_v45 = vpop.f32.mrf.mxu0 }
 0x54b   :  { %v841_v47 = vadd.f32 %v836_v43, %v831_v42  ;;  %v832_v48 = vmul.f32 %v830_v44, %v2315_v50  ;;  %v2047_v50 = vld [vmem:[%s2460_s2 + $0x120] sm:$0xff]  }
 0x54c   :  { %v821_v51 = vpop.f32.mrf.mxu0  ;;  %1278 = vmatpush1.bf16.msra.mxu1 %v2047_v50 }
 0x54d   :  { %vm843_vm8 = vcmp.ge.f32.partialorder %v841_v47, 0.0  ;;  %v845_v52 = vmul.f32 0.01, %v841_v47  ;;  %v842_v53 = vadd.f32 %v840_v49, %v832_v48  ;;  %1279 = vmatprep.subr.bf16.mxu1 %v2136_v17 }
 0x54f   :  { %v846_v54 = vmul.f32 0.01, %v842_v53  ;;  %vm844_vm9 = vcmp.ge.f32.partialorder %v842_v53, 0.0  ;;  %v847_v55 = vsel %vm843_vm8, %v841_v47, %v845_v52 }
 0x550   :  { %v882_v46 = vpack.c.bf16 %v847_v55, %v847_v55  ;;  %1280 = vmatpush1.bf16.msra.mxu1 %v2048_v58  ;;  %v2064_v55 = vld [vmem:[#allocation3 + $0x374] ss:$8 sps:$4 sm:$0xff]  }
 0x551   :  { %v848_v56 = vsel %vm844_vm9, %v842_v53, %v846_v54  ;;  %1281 = vmatprep.subr.bf16.mxu1 %v2136_v17  ;;  %v2058_v53 = vld [vmem:[%s2461_s3 + $0x54] ss:$8 sps:$4 sm:$0xff]   ;;  %v2059_v54 = vld [vmem:[%s2461_s3 + $0x40] ss:$8 sps:$4 sm:$0xff]  }
 0x552   :  { %v883_v57 = vpack.c.bf16 %v848_v56, %v848_v56  ;;  %1385 = vmatprep.subr.bf16.mxu0 %v2058_v53 }
 0x554   :  { %1076 = vmatprep.mubr.bf16.mxu0 %v883_v57  ;;  %1282 = vmatpush1.bf16.msra.mxu1 %v2049_v60 }
 0x555   :  { %1077 = vmatmul.mubr.bf16.vlgmr.msra.gmra.mxu0 %v882_v46  ;;  %1283 = vmatprep.subr.bf16.mxu1 %v2136_v17 }
 0x556   :  { %1405 = vmatprep.mubr.bf16.mxu0 %v2136_v17  ;;  %1386 = vmatpush1.bf16.msra.mxu0 %v2056_v59 }
 0x558   :  { %1284 = vmatpush1.bf16.msra.mxu1 %v2050_v61 }
 0x559   :  { %1285 = vmatprep.subr.bf16.mxu1 %v2136_v17 }
 0x55c   :  { %1286 = vmatpush1.bf16.msra.mxu1 %v2051_v62 }
 0x55d   :  { %1295 = vmatprep.subr.bf16.mxu1 %v2136_v17 }
 0x560   :  { %1296 = vmatpush2.bf16.msra.mxu1 %v2052_v63 }
 0x561   :  { %1297 = vmatprep.subr.bf16.mxu1 %v2136_v17 }
 0x564   :  { %1298 = vmatpush2.bf16.msra.mxu1 %v2053_v0 }
 0x565   :  { %1299 = vmatprep.subr.bf16.mxu1 %v2136_v17 }
 0x568   :  { %1300 = vmatpush2.bf16.msra.mxu1 %v2054_v2  ;;  %v1825_v2 = vld [vmem:[%s2462_s4 + $0x4] sm:$0x3] }
 0x569   :  { %1301 = vmatprep.subr.bf16.mxu1 %v2136_v17 }
 0x56c   :  { %1302 = vmatpush2.bf16.msra.mxu1 %v2055_v3 }
 0x615   :  { %v2404_v5 = vpop.f32.mrf.mxu0 }
 0x616   :  { %v1085_v6 = vsel %vm94_vm3, %v2404_v5, 0.0  ;;  %v1121_v7 = vmul.f32 %v2404_v5, %v2404_v5 }
 0x617   :  { %v1086_v8 = vrot.slane %v1085_v6, 4  ;;  %v2410_v9 = vpop.f32.mrf.mxu0 }
 0x618   :  { %v1123_v10 = vsel %vm94_vm3, %v1121_v7, 0.0  ;;  %v1093_v11 = vsel %vm1092_vm10, %v2410_v9, 0.0  ;;  %v1122_v17 = vmul.f32 %v2410_v9, %v2410_v9 }
 0x619   :  { %v1087_v12 = vadd.f32 %v1086_v8, %v1085_v6  ;;  %v1124_v13 = vrot.slane %v1123_v10, 4  ;;  %v1094_v14 = vrot.slane %v1093_v11, 4  ;;  %v1082_v16 = vpop.f32.mrf.mxu0 }
 0x61a   :  { %v1130_v20 = vsel %vm1092_vm10, %v1122_v17, 0.0  ;;  %v2067_v16 = vld [vmem:[#allocation3 + $0x364] ss:$8 sps:$4 sm:$0xff]  }
 0x61b   :  { %v1088_v22 = vrot.slane %v1087_v12, 2  ;;  %v1125_v23 = vadd.f32 %v1124_v13, %v1123_v10  ;;  %v1095_v24 = vadd.f32 %v1094_v14, %v1093_v11  ;;  %v1131_v25 = vrot.slane %v1130_v20, 4  ;;  %v1083_v26 = vpop.f32.mrf.mxu0  ;;  %v2062_v13 = vld [vmem:[#allocation3 + $0x370] ss:$8 sps:$4 sm:$0xff]  }
 0x61c   :  { %v2076_v26 = vld [vmem:[#allocation3 + $0x334] ss:$8 sps:$4 sm:$0xff]  }
 0x61d   :  { %v1089_v27 = vadd.f32 %v1088_v22, %v1087_v12  ;;  %v1126_v28 = vrot.slane %v1125_v23, 2  ;;  %v1096_v29 = vrot.slane %v1095_v24, 2  ;;  %v1132_v30 = vadd.f32 %v1131_v25, %v1130_v20  ;;  %v2065_v20 = vld [vmem:[#allocation3 + $0x360] ss:$8 sps:$4 sm:$0xff]   ;;  %v2070_v22 = vld [vmem:[#allocation3 + $0x354] ss:$8 sps:$4 sm:$0xff]  }
 0x61e   :  { %v2071_v25 = vld [vmem:[#allocation3 + $0x340] ss:$8 sps:$4 sm:$0xff]  }
 0x61f   :  { %v1090_v31 = vrot.slane %v1089_v27, 1  ;;  %v1127_v32 = vadd.f32 %v1126_v28, %v1125_v23  ;;  %v1097_v1 = vadd.f32 %v1096_v29, %v1095_v24  ;;  %v1133_v15 = vrot.slane %v1132_v30, 2  ;;  %v2068_v23 = vld [vmem:[#allocation3 + $0x350] ss:$8 sps:$4 sm:$0xff]   ;;  %v2073_v24 = vld [vmem:[#allocation3 + $0x344] ss:$8 sps:$4 sm:$0xff]  }
 0x620   :  { %v2079_v28 = vld [vmem:[#allocation3 + $0x324] ss:$8 sps:$4 sm:$0xff]   ;;  %v2077_v29 = vld [vmem:[#allocation3 + $0x320] ss:$8 sps:$4 sm:$0xff]  }
 0x621   :  { %v1128_v33 = vrot.slane %v1127_v32, 1  ;;  %v1098_v34 = vrot.slane %v1097_v1, 1  ;;  %v1134_v35 = vadd.f32 %v1133_v15, %v1132_v30  ;;  %v1091_v36 = vadd.f32 %v1090_v31, %v1089_v27  ;;  %v2074_v27 = vld [vmem:[#allocation3 + $0x330] ss:$8 sps:$4 sm:$0xff]   ;;  %v2082_v30 = vld [vmem:[#allocation3 + $0x314] ss:$8 sps:$4 sm:$0xff]  }
 0x622   :  { %v2080_v31 = vld [vmem:[#allocation3 + $0x310] ss:$8 sps:$4 sm:$0xff]   ;;  %v2088_v15 = vld [vmem:[#allocation3 + $0x3b4] ss:$8 sps:$4 sm:$0xff]  }
 0x623   :  { %v1099_v37 = vadd.f32 %v1098_v34, %v1097_v1  ;;  %v1135_v38 = vrot.slane %v1134_v35, 1  ;;  %v1129_v39 = vadd.f32 %v1128_v33, %v1127_v32  ;;  %v2085_v32 = vld [vmem:[#allocation3 + $0x304] ss:$8 sps:$4 sm:$0xff]   ;;  %v2083_v1 = vld [vmem:[#allocation3 + $0x300] ss:$8 sps:$4 sm:$0xff]  }
 0x624   :  { %v2086_v33 = vld [vmem:[#allocation3 + $0x3b0] ss:$8 sps:$4 sm:$0xff]   ;;  %v2091_v34 = vld [vmem:[#allocation3 + $0x3a4] ss:$8 sps:$4 sm:$0xff]  }
 0x625   :  { %v1102_v40 = vcombine.low %v1091_v36, %v1099_v37  ;;  %v1136_v41 = vadd.f32 %v1135_v38, %v1134_v35  ;;  %v2089_v35 = vld [vmem:[#allocation3 + $0x3a0] ss:$8 sps:$4 sm:$0xff]   ;;  %v2094_v36 = vld [vmem:[#allocation3 + $0x394] ss:$8 sps:$4 sm:$0xff]   ;;  %v2092_v37 = vld [vmem:[#allocation3 + $0x390] ss:$8 sps:$4 sm:$0xff]  }
 0x626   :  { %v2095_v38 = vld [vmem:[#allocation3 + $0x380] ss:$8 sps:$4 sm:$0xff]  }
 0x627   :  { %v1109_v42 = vrot.slane %v1102_v40, %v2324_v21  ;;  %v1139_v43 = vcombine.low %v1129_v39, %v1136_v41  ;;  %v2097_v39 = vld [vmem:[#allocation3 + $0x384] ss:$8 sps:$4 sm:$0xff]  }
 0x629   :  { %v1116_v44 = vrot.slane %v1109_v42, %v2324_v21  ;;  %v1146_v45 = vrot.slane %v1139_v43, %v2324_v21 }
 0x62b   :  { %v1153_v47 = vrot.slane %v1146_v45, %v2324_v21  ;;  %1120 = vst.msk [vmem:[#allocation2] ss:$2 sm:$0x3] %vm1118_vm11, %v1116_v44  ;;  %v2061_v21 = vld [vmem:[%s2461_s3 + $0x44] ss:$8 sps:$4 sm:$0xff]  }
 0x62c   :  { %1387 = vmatprep.subr.bf16.mxu0 %v2061_v21 }
 0x62d   :  { %1155 = vst.msk [vmem:[#allocation2 + $0x1] ss:$2 sm:$0x3] %vm1118_vm11, %v1153_v47  ;;  %1388 = vmatpush1.bf16.msra.mxu0 %v2059_v54 }
 0x62e   :  { %1603 = vmatprep.subr.bf16.mxu0 %v2064_v55 }
 0x634   :  { %v1787_v48 = vld.sshfl [vmem:[#allocation2] sm:$0x33 pattern:$0x76325410] }
 0x635   :  { %v1165_v49 = vcombine.high %v1787_v48, %v1787_v48  ;;  %v1168_v52 = vpack.c.bf16 %v1787_v48, %v1787_v48 }
 0x637   :  { %v1169_v51 = vpack.c.bf16 %v1165_v49, %v1165_v49 }
 0x639   :  { %1824 = vmatprep.mubr.msk.bf16.mxu1 %vm1267_vm12, %v1169_v51 }
 0x63a   :  { %1304 = vmatmul.mubr.bf16.vlgmr.msra.gmra.mxu1 %v1168_v52 }
 0x6fa   :  { %v1305_v56 = vpop.f32.mrf.mxu1 }
 0x6fb   :  { %v1311_v57 = vmul.f32 0.5, %v1305_v56 }
 0x6fc   :  { %v1307_v46 = vpop.f32.mrf.mxu1 }
 0x6fd   :  { %v1312_v50 = vmul.f32 %v1311_v57, %v1311_v57 }
 0x6fe   :  { %v1308_v58 = vpop.f32.mrf.mxu1 }
 0x6ff   :  { %v1314_v60 = vrot.slane %v1312_v50, 7 }
 0x700   :  { %v1309_v61 = vpop.f32.mrf.mxu1 }
 0x701   :  { %v1316_v62 = vsub.f32 %v1311_v57, %v1314_v60 }
 0x703   :  { %v1319_v63 = vadd.f32 1e-05, %v1316_v62 }
 0x705   :  { %2102 = vrsqrt.f32 %v1319_v63 }
 0x712   :  { %v2103_v0 = vpop.eup %2102 }
 0x713   :  { %v1322_v3 = vrot.slane %v2103_v0, 1 }
 0x715   :  { %v1324_v6 = vmul.f32 %v1825_v2, %v1322_v3 }
 0x717   :  { %v1325_v7 = vmul.f32 %v1324_v6, %v1311_v57  ;;  %1330 = vst.msk [vmem:[#allocation2] sm:$0x1] %vm236_vm4, %v1324_v6  ;;  %v1836_v57 = vld [vmem:[%s2463_s5 + $0x1] ss:$2 sm:$0x3] }
 0x718   :  { %v1477_v46 = vrot.slane %v1836_v57, %v2255_v19 }
 0x719   :  { %v1327_v8 = vrot.slane %v1325_v7, 7 }
 0x71b   :  { %v1329_v10 = vsub.f32 %v1825_v2, %v1327_v8 }
 0x71d   :  { %v1338_v11 = vrot.slane %v1329_v10, %v2244_v4 }
 0x71f   :  { %v1826_v17 = vrot.slane %v1338_v11, 9 }
 0x721   :  { %1342 = vst.msk [vmem:[#allocation2 + $0x1] sm:$0x1] %vm236_vm4, %v1826_v17 }
 0x728   :  { %v1343_v12 = vld [vmem:[#allocation2] sm:$0x3] }
 0x729   :  { %v1344_v14 = vpack.c.bf16 %v1343_v12, %v1343_v12 }
 0x72b   :  { %1835 = vmatmul.mubr.msk.bf16.vlgmr.msra.gmra.mxu0 %vm268_vm5, %v1344_v14 }
 0x72c   :  { %1604 = vmatpush1.bf16.msra.mxu0 %v2062_v13 }
 0x72d   :  { %1605 = vmatprep.subr.bf16.mxu0 %v2067_v16 }
 0x730   :  { %1606 = vmatpush1.bf16.msra.mxu0 %v2065_v20 }
 0x731   :  { %1607 = vmatprep.subr.bf16.mxu0 %v2070_v22 }
 0x734   :  { %1608 = vmatpush1.bf16.msra.mxu0 %v2068_v23 }
 0x735   :  { %1609 = vmatprep.subr.bf16.mxu0 %v2073_v24 }
 0x738   :  { %1610 = vmatpush1.bf16.msra.mxu0 %v2071_v25 }
 0x739   :  { %1611 = vmatprep.subr.bf16.mxu0 %v2076_v26 }
 0x73c   :  { %1612 = vmatpush1.bf16.msra.mxu0 %v2074_v27 }
 0x73d   :  { %1613 = vmatprep.subr.bf16.mxu0 %v2079_v28 }
 0x740   :  { %1614 = vmatpush1.bf16.msra.mxu0 %v2077_v29 }
 0x741   :  { %1615 = vmatprep.subr.bf16.mxu0 %v2082_v30 }
 0x744   :  { %1616 = vmatpush1.bf16.msra.mxu0 %v2080_v31 }
 0x745   :  { %1617 = vmatprep.subr.bf16.mxu0 %v2085_v32 }
 0x748   :  { %1618 = vmatpush1.bf16.msra.mxu0 %v2083_v1 }
 0x749   :  { %1627 = vmatprep.subr.bf16.mxu0 %v2088_v15 }
 0x74c   :  { %1628 = vmatpush2.bf16.msra.mxu0 %v2086_v33 }
 0x74d   :  { %1629 = vmatprep.subr.bf16.mxu0 %v2091_v34 }
 0x750   :  { %1630 = vmatpush2.bf16.msra.mxu0 %v2089_v35 }
 0x751   :  { %1631 = vmatprep.subr.bf16.mxu0 %v2094_v36 }
 0x754   :  { %1632 = vmatpush2.bf16.msra.mxu0 %v2092_v37 }
 0x755   :  { %1633 = vmatprep.subr.bf16.mxu0 %v2097_v39 }
 0x758   :  { %1634 = vmatpush2.bf16.msra.mxu0 %v2095_v38 }
 0x7eb   :  { %v1407_v40 = vpop.f32.mrf.mxu0 }
 0x7ec   :  { %v1417_v41 = vrot.slane %v1407_v40, %v2252_v18  ;;  %v1427_v44 = vrot.slane %v1407_v40, %v2255_v19 }
 0x7ed   :  { %v1409_v42 = vpop.f32.mrf.mxu0 }
 0x7ee   :  { %v1422_v43 = vmul.f32 %v1417_v41, %v2404_v5  ;;  %v1421_v45 = vrot.slane %v1409_v42, %v2252_v18  ;;  %v1431_v51 = vrot.slane %v1409_v42, %v2255_v19 }
 0x7ef   :  { %v1411_v47 = vpop.f32.mrf.mxu0 }
 0x7f0   :  { %v1432_v48 = vadd.f32 %v1427_v44, %v1422_v43  ;;  %v1423_v49 = vmul.f32 %v1421_v45, %v2410_v9  ;;  %v1473_v9 = vrot.slane %v1836_v57, %v2252_v18 }
 0x7f1   :  { %v1412_v52 = vpop.f32.mrf.mxu0 }
 0x7f2   :  { %vm1434_vm13 = vcmp.ge.f32.partialorder %v1432_v48, 0.0  ;;  %v1436_v59 = vmul.f32 0.01, %v1432_v48  ;;  %v1433_v53 = vadd.f32 %v1431_v51, %v1423_v49 }
 0x7f4   :  { %vm1435_vm14 = vcmp.ge.f32.partialorder %v1433_v53, 0.0  ;;  %v1437_v21 = vmul.f32 0.01, %v1433_v53  ;;  %v1438_v54 = vsel %vm1434_vm13, %v1432_v48, %v1436_v59 }
 0x7f5   :  { %v1440_v5 = vpack.c.bf16 %v1438_v54, %v1438_v54 }
 0x7f6   :  { %v1439_v55 = vsel %vm1435_vm14, %v1433_v53, %v1437_v21 }
 0x7f7   :  { %v1441_v56 = vpack.c.bf16 %v1439_v55, %v1439_v55 }
 0x7f9   :  { %1861 = vmatprep.mubr.msk.bf16.mxu0 %vm1267_vm12, %v1441_v56 }
 0x7fa   :  { %1636 = vmatmul.mubr.bf16.vlgmr.msra.gmra.mxu0 %v1440_v5 }
 0x8ba   :  { %v1637_v50 = vpop.f32.mrf.mxu0 }
 0x8bb   :  { %v1638_v58 = vadd.f32 %v1637_v50, %v1473_v9 }
 0x8bc   :  { %v1639_v60 = vpop.f32.mrf.mxu0 }
 0x8bd   :  { %v1640_v61 = vadd.f32 %v1639_v60, %v1477_v46  ;;  %2104 = vtanh.f32 %v1638_v58 }
 0x8be   :  { %v1641_v62 = vpop.f32.mrf.mxu0 }
 0x8bf   :  { %2106 = vtanh.f32 %v1640_v61 }
 0x8c0   :  { %v1642_v63 = vpop.f32.mrf.mxu0 }
 0x8ca   :  { %v2105_v0 = vpop.eup %2104 }
 0x8cc   :  { %v2107_v2 = vpop.eup %2106 }
 0x8cd   :  { %v1648_v3 = vcombine.low %v2105_v0, %v2107_v2 }
 0x8cf   :  { %v1655_v6 = vrot.slane %v1648_v3, %v2244_v4 }
 0x8d1   :  { %1659 = vst.msk [vmem:[%s2464_s6] sm:$0xf] %vm1658_vm0, %v1655_v6 }
 0x8d2   :  { %1664 = vsyncpa [#allocation4], 1 }

</bundles_post_ra>
